<compile_context>
chip_gen: v7x
topology: tpu7x:2x2x1
jax: 0.10.0
libtpu: 0.0.40
codegen_flags: <defaults>
</compile_context>

<pallas_src>
import functools

import jax
import jax.numpy as jnp
import numpy as np
from jax.experimental import pallas as pl
from jax.experimental.pallas import tpu as pltpu


# --------------------------------------------------------------------------- #
# Fused encoder kernel: all DownBlock2d stages for one batch element.
# --------------------------------------------------------------------------- #
def _encoder_kernel(stage_dims, x_ref, *refs):
    n_stages = len(stage_dims)
    in_refs = refs[:5 * n_stages]
    out_refs = refs[5 * n_stages:]

    cur = x_ref[0]                                        # (H0, W0*Cin0) f32
    for s, (H, W, Cin, Cout) in enumerate(stage_dims):
        bw_ref, sc_ref, sh_ref, prow_ref, pcol_ref = in_refs[5 * s:5 * s + 5]
        o_ref = out_refs[s]

        # --- 3x3 conv (pad=1) as three row-shifted banded matmuls (MXU) ---
        zero_row = jnp.zeros((1, W * Cin), cur.dtype)
        acc = None
        for oy in (-1, 0, 1):
            if oy == 0:
                xs = cur
            elif oy == 1:                                  # xs[h] = cur[h+1]
                xs = jnp.concatenate([cur[1:], zero_row], axis=0)
            else:                                          # xs[h] = cur[h-1]
                xs = jnp.concatenate([zero_row, cur[:H - 1]], axis=0)
            part = jnp.dot(xs.astype(jnp.bfloat16), bw_ref[oy + 1],
                           preferred_element_type=jnp.float32)
            acc = part if acc is None else acc + part      # (H, W*Cout) f32

        # --- folded conv-bias + BatchNorm(eval) + ReLU: one FMA + max ---
        y = jnp.maximum(acc * sc_ref[...] + sh_ref[...], 0.0)

        # --- 2x2 average pool as two constant matmuls (0.5 * 0.5 = 0.25) ---
        t = jnp.dot(prow_ref[...], y.astype(jnp.bfloat16),
                    preferred_element_type=jnp.float32)     # (H/2, W*Cout)
        pooled = jnp.dot(t.astype(jnp.bfloat16), pcol_ref[...],
                         preferred_element_type=jnp.float32)  # (H/2, (W/2)*Cout)

        o_ref[0] = pooled.astype(o_ref.dtype)              # lane-dense store
        cur = pooled                                       # next stage input


# --------------------------------------------------------------------------- #
# Host-side (setup-time) parameter folding helpers
# --------------------------------------------------------------------------- #
def _make_banded_weight(weight, W):
    """(Cout, Cin, 3, 3) conv weight -> (3, W*Cin, W*Cout) block-tridiagonal bf16."""
    w = np.asarray(weight)
    Cout, Cin = w.shape[0], w.shape[1]
    wt = np.transpose(w, (2, 3, 1, 0))                     # (ky, kx, Cin, Cout)
    bw = np.zeros((3, W * Cin, W * Cout), np.float32)
    for ky in range(3):
        for kx in range(3):
            ox = kx - 1
            for col in range(W):                           # output spatial col
                src = col + ox                             # input spatial col
                if 0 <= src < W:
                    bw[ky, src * Cin:(src + 1) * Cin,
                       col * Cout:(col + 1) * Cout] = wt[ky, kx]
    return jnp.asarray(bw, dtype=jnp.bfloat16)


def _make_pool_mats(H, W, Cout):
    """Constant matrices so that AvgPool2x2(planar) = Prow @ y @ Pcol."""
    Hh, Wh = H // 2, W // 2
    prow = np.zeros((Hh, H), np.float32)
    prow[np.arange(Hh), 2 * np.arange(Hh)] = 0.5
    prow[np.arange(Hh), 2 * np.arange(Hh) + 1] = 0.5
    pcol = np.zeros((W * Cout, Wh * Cout), np.float32)
    cols = np.arange(W * Cout)
    wi = cols // Cout
    ci = cols % Cout
    pcol[cols, (wi // 2) * Cout + ci] = 0.5
    return jnp.asarray(prow, jnp.bfloat16), jnp.asarray(pcol, jnp.bfloat16)


def _fold_bn(p, W, eps=1e-5):
    """Fold conv bias + eval-mode BN into lane-tiled (1, W*Cout) scale/shift."""
    inv_std = 1.0 / np.sqrt(np.asarray(p["running_var"]) + eps)
    scale = np.asarray(p["gamma"]) * inv_std
    shift = (np.asarray(p["beta"])
             + (np.asarray(p["bias"]) - np.asarray(p["running_mean"])) * scale)
    scale2 = np.tile(scale, W).reshape(1, -1).astype(np.float32)
    shift2 = np.tile(shift, W).reshape(1, -1).astype(np.float32)
    return jnp.asarray(scale2), jnp.asarray(shift2)


# --------------------------------------------------------------------------- #
# Parameter construction (deterministic, mirrors Encoder.__init__ shapes)
# --------------------------------------------------------------------------- #
def make_encoder_params(key, block_expansion, in_features, num_blocks=3,
                        max_features=256):
    params = []
    for i in range(num_blocks):
        cin = in_features if i == 0 else min(max_features,
                                             block_expansion * (2 ** i))
        cout = min(max_features, block_expansion * (2 ** (i + 1)))
        key, kw, kb, kg, kbe, km, kv = jax.random.split(key, 7)
        weight = 0.1 * jax.random.normal(kw, (cout, cin, 3, 3), jnp.float32)
        bias = 0.1 * jax.random.normal(kb, (cout,), jnp.float32)
        gamma = 1.0 + 0.1 * jax.random.normal(kg, (cout,), jnp.float32)
        beta = 0.1 * jax.random.normal(kbe, (cout,), jnp.float32)
        running_mean = 0.1 * jax.random.normal(km, (cout,), jnp.float32)
        running_var = jax.random.uniform(kv, (cout,), jnp.float32, 0.5, 1.5)
        params.append(dict(weight=weight, bias=bias, gamma=gamma, beta=beta,
                           running_mean=running_mean, running_var=running_var,
                           cin=cin, cout=cout))
    return params


# --------------------------------------------------------------------------- #
# Encoder forward (single fused Pallas call)
# --------------------------------------------------------------------------- #
def encoder_forward(x_nchw, params):
    """Mirrors Encoder.forward: returns [x, out1, out2, ...] in NCHW."""
    N, C0, H0, W0 = x_nchw.shape
    x_planar = jnp.transpose(x_nchw, (0, 2, 3, 1)).reshape(N, H0, W0 * C0)
    x_planar = x_planar.astype(jnp.float32)

    stage_dims = []
    operands = []
    in_specs = [pl.BlockSpec((1, H0, W0 * C0), lambda n: (n, 0, 0))]
    out_shapes = []
    out_specs = []

    H, W = H0, W0
    for p in params:
        assert H % 2 == 0 and W % 2 == 0, "even spatial dims required per stage"
        Cin, Cout = p["cin"], p["cout"]
        stage_dims.append((H, W, Cin, Cout))

        bw = _make_banded_weight(p["weight"], W)           # (3, W*Cin, W*Cout)
        scale2, shift2 = _fold_bn(p, W)                    # (1, W*Cout)
        prow, pcol = _make_pool_mats(H, W, Cout)           # (H/2,H), (W*Cout,(W/2)*Cout)
        operands += [bw, scale2, shift2, prow, pcol]
        in_specs += [
            pl.BlockSpec(bw.shape, lambda n: (0, 0, 0)),
            pl.BlockSpec(scale2.shape, lambda n: (0, 0)),
            pl.BlockSpec(shift2.shape, lambda n: (0, 0)),
            pl.BlockSpec(prow.shape, lambda n: (0, 0)),
            pl.BlockSpec(pcol.shape, lambda n: (0, 0)),
        ]

        Hh, Wh = H // 2, W // 2
        out_shapes.append(jax.ShapeDtypeStruct((N, Hh, Wh * Cout), jnp.float32))
        out_specs.append(pl.BlockSpec((1, Hh, Wh * Cout), lambda n: (n, 0, 0)))
        H, W = Hh, Wh

    kernel = functools.partial(_encoder_kernel, tuple(stage_dims))
    outs_planar = pl.pallas_call(
        kernel,
        out_shape=tuple(out_shapes),
        grid=(N,),
        in_specs=in_specs,
        out_specs=tuple(out_specs),
        compiler_params=pltpu.CompilerParams(
            dimension_semantics=("parallel",)),
    )(x_planar, *operands)

    outs = [x_nchw]
    for (Hs, Ws, _, Cout), o in zip(stage_dims, outs_planar):
        Hh, Wh = Hs // 2, Ws // 2
        o_nhwc = o.reshape(N, Hh, Wh, Cout)
        outs.append(jnp.transpose(o_nhwc, (0, 3, 1, 2)))
    return outs


# --------------------------------------------------------------------------- #
# Pure-JAX reference (for correctness check)
# --------------------------------------------------------------------------- #
def encoder_reference(x_nchw, params, eps=1e-5):
    x = jnp.transpose(x_nchw, (0, 2, 3, 1))                # NHWC
    outs = [x]
    for p in params:
        cur = outs[-1]
        w_hwio = jnp.transpose(p["weight"], (2, 3, 1, 0))
        y = jax.lax.conv_general_dilated(
            cur, w_hwio, window_strides=(1, 1), padding=((1, 1), (1, 1)),
            dimension_numbers=("NHWC", "HWIO", "NHWC"))
        y = y + p["bias"]
        inv_std = 1.0 / jnp.sqrt(p["running_var"] + eps)
        y = (y - p["running_mean"]) * inv_std * p["gamma"] + p["beta"]
        y = jnp.maximum(y, 0.0)
        N, H, W, C = y.shape
        y = y.reshape(N, H // 2, 2, W // 2, 2, C).mean(axis=(2, 4))
        outs.append(y)
    return [jnp.transpose(o, (0, 3, 1, 2)) for o in outs]


# --------------------------------------------------------------------------- #
if __name__ == "__main__":
    key = jax.random.PRNGKey(0)
    kx, kp = jax.random.split(key)

    # Encoder(block_expansion=8, in_features=4, num_blocks=3, max_features=256),
    # x: (2, 4, 16, 16) NCHW.
    N, C, Hsp, Wsp = 2, 4, 16, 16
    x = jax.random.normal(kx, (N, C, Hsp, Wsp), jnp.float32)
    params = make_encoder_params(kp, block_expansion=8, in_features=4,
                                 num_blocks=3, max_features=256)

    outs = encoder_forward(x, params)
    outs = [jax.block_until_ready(o) for o in outs]

    refs = encoder_reference(x, params)
    refs = [jax.block_until_ready(r) for r in refs]

    assert len(outs) == 4
    expected_shapes = [(2, 4, 16, 16), (2, 16, 8, 8), (2, 32, 4, 4), (2, 64, 2, 2)]
    for o, r, s in zip(outs, refs, expected_shapes):
        assert o.shape == s, (o.shape, s)
        np.testing.assert_allclose(np.asarray(o), np.asarray(r),
                                   rtol=2e-2, atol=2e-2)

    print("KERNEL_OK")
</pallas_src>

<mosaic_0001>
module attributes {stable_mosaic.version = 11 : i64} {
  func.func @_encoder_kernel(%arg0: i32, %arg1: memref<1x16x64xf32, #tpu.memory_space<vmem>>, %arg2: memref<3x64x256xbf16, #tpu.memory_space<vmem>>, %arg3: memref<1x256xf32, #tpu.memory_space<vmem>>, %arg4: memref<1x256xf32, #tpu.memory_space<vmem>>, %arg5: memref<8x16xbf16, #tpu.memory_space<vmem>>, %arg6: memref<256x128xbf16, #tpu.memory_space<vmem>>, %arg7: memref<3x128x256xbf16, #tpu.memory_space<vmem>>, %arg8: memref<1x256xf32, #tpu.memory_space<vmem>>, %arg9: memref<1x256xf32, #tpu.memory_space<vmem>>, %arg10: memref<4x8xbf16, #tpu.memory_space<vmem>>, %arg11: memref<256x128xbf16, #tpu.memory_space<vmem>>, %arg12: memref<3x128x256xbf16, #tpu.memory_space<vmem>>, %arg13: memref<1x256xf32, #tpu.memory_space<vmem>>, %arg14: memref<1x256xf32, #tpu.memory_space<vmem>>, %arg15: memref<2x4xbf16, #tpu.memory_space<vmem>>, %arg16: memref<256x128xbf16, #tpu.memory_space<vmem>>, %arg17: memref<1x8x128xf32, #tpu.memory_space<vmem>>, %arg18: memref<1x4x128xf32, #tpu.memory_space<vmem>>, %arg19: memref<1x2x128xf32, #tpu.memory_space<vmem>>) attributes {dimension_semantics = [#tpu.dimension_semantics<parallel>], iteration_bounds = array<i64: 2>, scalar_prefetch = 0 : i64, scratch_operands = 0 : i64, tpu.core_type = #tpu.core_type<tc>, window_params = [{transform_indices = @transform_0, window_bounds = array<i64: 1, 16, 64>}, {pipeline_mode = #tpu.pipeline_mode<synchronous>, transform_indices = @transform_1, window_bounds = array<i64: 3, 64, 256>}, {pipeline_mode = #tpu.pipeline_mode<synchronous>, transform_indices = @transform_2, window_bounds = array<i64: 1, 256>}, {pipeline_mode = #tpu.pipeline_mode<synchronous>, transform_indices = @transform_3, window_bounds = array<i64: 1, 256>}, {pipeline_mode = #tpu.pipeline_mode<synchronous>, transform_indices = @transform_4, window_bounds = array<i64: 8, 16>}, {pipeline_mode = #tpu.pipeline_mode<synchronous>, transform_indices = @transform_5, window_bounds = array<i64: 256, 128>}, {pipeline_mode = #tpu.pipeline_mode<synchronous>, transform_indices = @transform_6, window_bounds = array<i64: 3, 128, 256>}, {pipeline_mode = #tpu.pipeline_mode<synchronous>, transform_indices = @transform_7, window_bounds = array<i64: 1, 256>}, {pipeline_mode = #tpu.pipeline_mode<synchronous>, transform_indices = @transform_8, window_bounds = array<i64: 1, 256>}, {pipeline_mode = #tpu.pipeline_mode<synchronous>, transform_indices = @transform_9, window_bounds = array<i64: 4, 8>}, {pipeline_mode = #tpu.pipeline_mode<synchronous>, transform_indices = @transform_10, window_bounds = array<i64: 256, 128>}, {pipeline_mode = #tpu.pipeline_mode<synchronous>, transform_indices = @transform_11, window_bounds = array<i64: 3, 128, 256>}, {pipeline_mode = #tpu.pipeline_mode<synchronous>, transform_indices = @transform_12, window_bounds = array<i64: 1, 256>}, {pipeline_mode = #tpu.pipeline_mode<synchronous>, transform_indices = @transform_13, window_bounds = array<i64: 1, 256>}, {pipeline_mode = #tpu.pipeline_mode<synchronous>, transform_indices = @transform_14, window_bounds = array<i64: 2, 4>}, {pipeline_mode = #tpu.pipeline_mode<synchronous>, transform_indices = @transform_15, window_bounds = array<i64: 256, 128>}, {transform_indices = @transform_16, window_bounds = array<i64: 1, 8, 128>}, {transform_indices = @transform_17, window_bounds = array<i64: 1, 4, 128>}, {transform_indices = @transform_18, window_bounds = array<i64: 1, 2, 128>}]} {
    %c0 = arith.constant 0 : index
    %c0_0 = arith.constant 0 : index
    %c0_1 = arith.constant 0 : index
    %0 = vector.load %arg1[%c0, %c0_0, %c0_1] : memref<1x16x64xf32, #tpu.memory_space<vmem>>, vector<1x16x64xf32>
    %1 = vector.shape_cast %0 : vector<1x16x64xf32> to vector<16x64xf32>
    %cst = arith.constant 0.000000e+00 : f32
    %2 = vector.broadcast %cst : f32 to vector<1x64xf32>
    %3 = vector.extract_strided_slice %1 {offsets = [0, 0], sizes = [15, 64], strides = [1, 1]} : vector<16x64xf32> to vector<15x64xf32>
    %4 = tpu.concatenate %2, %3 in 0 : vector<1x64xf32>, vector<15x64xf32> -> vector<16x64xf32>
    %5 = arith.truncf %4 : vector<16x64xf32> to vector<16x64xbf16>
    %c0_2 = arith.constant 0 : index
    %c0_3 = arith.constant 0 : index
    %c0_4 = arith.constant 0 : index
    %6 = vector.load %arg2[%c0_2, %c0_3, %c0_4] : memref<3x64x256xbf16, #tpu.memory_space<vmem>>, vector<1x64x256xbf16>
    %7 = vector.shape_cast %6 : vector<1x64x256xbf16> to vector<64x256xbf16>
    %cst_5 = arith.constant dense<0.000000e+00> : vector<16x256xf32>
    %8 = tpu.matmul %5, %7, %cst_5 {dimension_numbers = #tpu.dot_dimension_numbers<[1], [0], [0], [1], [0, 0, 1, 1], [], []>} : vector<16x64xbf16>, vector<64x256xbf16>, vector<16x256xf32> -> vector<16x256xf32>
    %9 = arith.truncf %1 : vector<16x64xf32> to vector<16x64xbf16>
    %c1 = arith.constant 1 : index
    %c0_6 = arith.constant 0 : index
    %c0_7 = arith.constant 0 : index
    %10 = vector.load %arg2[%c1, %c0_6, %c0_7] : memref<3x64x256xbf16, #tpu.memory_space<vmem>>, vector<1x64x256xbf16>
    %11 = vector.shape_cast %10 : vector<1x64x256xbf16> to vector<64x256xbf16>
    %cst_8 = arith.constant dense<0.000000e+00> : vector<16x256xf32>
    %12 = tpu.matmul %9, %11, %cst_8 {dimension_numbers = #tpu.dot_dimension_numbers<[1], [0], [0], [1], [0, 0, 1, 1], [], []>} : vector<16x64xbf16>, vector<64x256xbf16>, vector<16x256xf32> -> vector<16x256xf32>
    %13 = arith.addf %8, %12 : vector<16x256xf32>
    %14 = vector.extract_strided_slice %1 {offsets = [1, 0], sizes = [15, 64], strides = [1, 1]} : vector<16x64xf32> to vector<15x64xf32>
    %15 = tpu.concatenate %14, %2 in 0 : vector<15x64xf32>, vector<1x64xf32> -> vector<16x64xf32>
    %16 = arith.truncf %15 : vector<16x64xf32> to vector<16x64xbf16>
    %c2 = arith.constant 2 : index
    %c0_9 = arith.constant 0 : index
    %c0_10 = arith.constant 0 : index
    %17 = vector.load %arg2[%c2, %c0_9, %c0_10] : memref<3x64x256xbf16, #tpu.memory_space<vmem>>, vector<1x64x256xbf16>
    %18 = vector.shape_cast %17 : vector<1x64x256xbf16> to vector<64x256xbf16>
    %cst_11 = arith.constant dense<0.000000e+00> : vector<16x256xf32>
    %19 = tpu.matmul %16, %18, %cst_11 {dimension_numbers = #tpu.dot_dimension_numbers<[1], [0], [0], [1], [0, 0, 1, 1], [], []>} : vector<16x64xbf16>, vector<64x256xbf16>, vector<16x256xf32> -> vector<16x256xf32>
    %20 = arith.addf %13, %19 : vector<16x256xf32>
    %c0_12 = arith.constant 0 : index
    %c0_13 = arith.constant 0 : index
    %21 = vector.load %arg3[%c0_12, %c0_13] : memref<1x256xf32, #tpu.memory_space<vmem>>, vector<1x256xf32>
    %22 = vector.broadcast %21 : vector<1x256xf32> to vector<16x256xf32>
    %23 = arith.mulf %20, %22 : vector<16x256xf32>
    %c0_14 = arith.constant 0 : index
    %c0_15 = arith.constant 0 : index
    %24 = vector.load %arg4[%c0_14, %c0_15] : memref<1x256xf32, #tpu.memory_space<vmem>>, vector<1x256xf32>
    %25 = vector.broadcast %24 : vector<1x256xf32> to vector<16x256xf32>
    %26 = arith.addf %23, %25 : vector<16x256xf32>
    %cst_16 = arith.constant 0.000000e+00 : f32
    %27 = vector.broadcast %cst_16 : f32 to vector<16x256xf32>
    %28 = arith.maximumf %26, %27 : vector<16x256xf32>
    %c0_17 = arith.constant 0 : index
    %c0_18 = arith.constant 0 : index
    %29 = vector.load %arg5[%c0_17, %c0_18] : memref<8x16xbf16, #tpu.memory_space<vmem>>, vector<8x16xbf16>
    %30 = arith.truncf %28 : vector<16x256xf32> to vector<16x256xbf16>
    %cst_19 = arith.constant dense<0.000000e+00> : vector<8x256xf32>
    %31 = tpu.matmul %29, %30, %cst_19 {dimension_numbers = #tpu.dot_dimension_numbers<[1], [0], [0], [1], [0, 0, 1, 1], [], []>} : vector<8x16xbf16>, vector<16x256xbf16>, vector<8x256xf32> -> vector<8x256xf32>
    %32 = arith.truncf %31 : vector<8x256xf32> to vector<8x256xbf16>
    %c0_20 = arith.constant 0 : index
    %c0_21 = arith.constant 0 : index
    %33 = vector.load %arg6[%c0_20, %c0_21] : memref<256x128xbf16, #tpu.memory_space<vmem>>, vector<256x128xbf16>
    %cst_22 = arith.constant dense<0.000000e+00> : vector<8x128xf32>
    %34 = tpu.matmul %32, %33, %cst_22 {dimension_numbers = #tpu.dot_dimension_numbers<[1], [0], [0], [1], [0, 0, 1, 1], [], []>} : vector<8x256xbf16>, vector<256x128xbf16>, vector<8x128xf32> -> vector<8x128xf32>
    %c0_23 = arith.constant 0 : index
    %c0_24 = arith.constant 0 : index
    %c0_25 = arith.constant 0 : index
    %35 = vector.load %arg17[%c0_23, %c0_24, %c0_25] : memref<1x8x128xf32, #tpu.memory_space<vmem>>, vector<1x8x128xf32>
    %36 = vector.shape_cast %35 : vector<1x8x128xf32> to vector<8x128xf32>
    %37 = vector.shape_cast %34 : vector<8x128xf32> to vector<1x8x128xf32>
    tpu.vector_store %arg17[%c0_23, %c0_24, %c0_25], %37 {strides = array<i32>} : memref<1x8x128xf32, #tpu.memory_space<vmem>>, vector<1x8x128xf32>,
    %cst_26 = arith.constant 0.000000e+00 : f32
    %38 = vector.broadcast %cst_26 : f32 to vector<1x128xf32>
    %39 = vector.extract_strided_slice %34 {offsets = [0, 0], sizes = [7, 128], strides = [1, 1]} : vector<8x128xf32> to vector<7x128xf32>
    %40 = tpu.concatenate %38, %39 in 0 : vector<1x128xf32>, vector<7x128xf32> -> vector<8x128xf32>
    %41 = arith.truncf %40 : vector<8x128xf32> to vector<8x128xbf16>
    %c0_27 = arith.constant 0 : index
    %c0_28 = arith.constant 0 : index
    %c0_29 = arith.constant 0 : index
    %42 = vector.load %arg7[%c0_27, %c0_28, %c0_29] : memref<3x128x256xbf16, #tpu.memory_space<vmem>>, vector<1x128x256xbf16>
    %43 = vector.shape_cast %42 : vector<1x128x256xbf16> to vector<128x256xbf16>
    %cst_30 = arith.constant dense<0.000000e+00> : vector<8x256xf32>
    %44 = tpu.matmul %41, %43, %cst_30 {dimension_numbers = #tpu.dot_dimension_numbers<[1], [0], [0], [1], [0, 0, 1, 1], [], []>} : vector<8x128xbf16>, vector<128x256xbf16>, vector<8x256xf32> -> vector<8x256xf32>
    %45 = arith.truncf %34 : vector<8x128xf32> to vector<8x128xbf16>
    %c1_31 = arith.constant 1 : index
    %c0_32 = arith.constant 0 : index
    %c0_33 = arith.constant 0 : index
    %46 = vector.load %arg7[%c1_31, %c0_32, %c0_33] : memref<3x128x256xbf16, #tpu.memory_space<vmem>>, vector<1x128x256xbf16>
    %47 = vector.shape_cast %46 : vector<1x128x256xbf16> to vector<128x256xbf16>
    %cst_34 = arith.constant dense<0.000000e+00> : vector<8x256xf32>
    %48 = tpu.matmul %45, %47, %cst_34 {dimension_numbers = #tpu.dot_dimension_numbers<[1], [0], [0], [1], [0, 0, 1, 1], [], []>} : vector<8x128xbf16>, vector<128x256xbf16>, vector<8x256xf32> -> vector<8x256xf32>
    %49 = arith.addf %44, %48 : vector<8x256xf32>
    %50 = vector.extract_strided_slice %34 {offsets = [1, 0], sizes = [7, 128], strides = [1, 1]} : vector<8x128xf32> to vector<7x128xf32>
    %51 = tpu.concatenate %50, %38 in 0 : vector<7x128xf32>, vector<1x128xf32> -> vector<8x128xf32>
    %52 = arith.truncf %51 : vector<8x128xf32> to vector<8x128xbf16>
    %c2_35 = arith.constant 2 : index
    %c0_36 = arith.constant 0 : index
    %c0_37 = arith.constant 0 : index
    %53 = vector.load %arg7[%c2_35, %c0_36, %c0_37] : memref<3x128x256xbf16, #tpu.memory_space<vmem>>, vector<1x128x256xbf16>
    %54 = vector.shape_cast %53 : vector<1x128x256xbf16> to vector<128x256xbf16>
    %cst_38 = arith.constant dense<0.000000e+00> : vector<8x256xf32>
    %55 = tpu.matmul %52, %54, %cst_38 {dimension_numbers = #tpu.dot_dimension_numbers<[1], [0], [0], [1], [0, 0, 1, 1], [], []>} : vector<8x128xbf16>, vector<128x256xbf16>, vector<8x256xf32> -> vector<8x256xf32>
    %56 = arith.addf %49, %55 : vector<8x256xf32>
    %c0_39 = arith.constant 0 : index
    %c0_40 = arith.constant 0 : index
    %57 = vector.load %arg8[%c0_39, %c0_40] : memref<1x256xf32, #tpu.memory_space<vmem>>, vector<1x256xf32>
    %58 = vector.broadcast %57 : vector<1x256xf32> to vector<8x256xf32>
    %59 = arith.mulf %56, %58 : vector<8x256xf32>
    %c0_41 = arith.constant 0 : index
    %c0_42 = arith.constant 0 : index
    %60 = vector.load %arg9[%c0_41, %c0_42] : memref<1x256xf32, #tpu.memory_space<vmem>>, vector<1x256xf32>
    %61 = vector.broadcast %60 : vector<1x256xf32> to vector<8x256xf32>
    %62 = arith.addf %59, %61 : vector<8x256xf32>
    %cst_43 = arith.constant 0.000000e+00 : f32
    %63 = vector.broadcast %cst_43 : f32 to vector<8x256xf32>
    %64 = arith.maximumf %62, %63 : vector<8x256xf32>
    %c0_44 = arith.constant 0 : index
    %c0_45 = arith.constant 0 : index
    %65 = vector.load %arg10[%c0_44, %c0_45] : memref<4x8xbf16, #tpu.memory_space<vmem>>, vector<4x8xbf16>
    %66 = arith.truncf %64 : vector<8x256xf32> to vector<8x256xbf16>
    %cst_46 = arith.constant dense<0.000000e+00> : vector<4x256xf32>
    %67 = tpu.matmul %65, %66, %cst_46 {dimension_numbers = #tpu.dot_dimension_numbers<[1], [0], [0], [1], [0, 0, 1, 1], [], []>} : vector<4x8xbf16>, vector<8x256xbf16>, vector<4x256xf32> -> vector<4x256xf32>
    %68 = arith.truncf %67 : vector<4x256xf32> to vector<4x256xbf16>
    %c0_47 = arith.constant 0 : index
    %c0_48 = arith.constant 0 : index
    %69 = vector.load %arg11[%c0_47, %c0_48] : memref<256x128xbf16, #tpu.memory_space<vmem>>, vector<256x128xbf16>
    %cst_49 = arith.constant dense<0.000000e+00> : vector<4x128xf32>
    %70 = tpu.matmul %68, %69, %cst_49 {dimension_numbers = #tpu.dot_dimension_numbers<[1], [0], [0], [1], [0, 0, 1, 1], [], []>} : vector<4x256xbf16>, vector<256x128xbf16>, vector<4x128xf32> -> vector<4x128xf32>
    %c0_50 = arith.constant 0 : index
    %c0_51 = arith.constant 0 : index
    %c0_52 = arith.constant 0 : index
    %71 = vector.load %arg18[%c0_50, %c0_51, %c0_52] : memref<1x4x128xf32, #tpu.memory_space<vmem>>, vector<1x4x128xf32>
    %72 = vector.shape_cast %71 : vector<1x4x128xf32> to vector<4x128xf32>
    %73 = vector.shape_cast %70 : vector<4x128xf32> to vector<1x4x128xf32>
    tpu.vector_store %arg18[%c0_50, %c0_51, %c0_52], %73 {strides = array<i32>} : memref<1x4x128xf32, #tpu.memory_space<vmem>>, vector<1x4x128xf32>,
    %cst_53 = arith.constant 0.000000e+00 : f32
    %74 = vector.broadcast %cst_53 : f32 to vector<1x128xf32>
    %75 = vector.extract_strided_slice %70 {offsets = [0, 0], sizes = [3, 128], strides = [1, 1]} : vector<4x128xf32> to vector<3x128xf32>
    %76 = tpu.concatenate %74, %75 in 0 : vector<1x128xf32>, vector<3x128xf32> -> vector<4x128xf32>
    %77 = arith.truncf %76 : vector<4x128xf32> to vector<4x128xbf16>
    %c0_54 = arith.constant 0 : index
    %c0_55 = arith.constant 0 : index
    %c0_56 = arith.constant 0 : index
    %78 = vector.load %arg12[%c0_54, %c0_55, %c0_56] : memref<3x128x256xbf16, #tpu.memory_space<vmem>>, vector<1x128x256xbf16>
    %79 = vector.shape_cast %78 : vector<1x128x256xbf16> to vector<128x256xbf16>
    %cst_57 = arith.constant dense<0.000000e+00> : vector<4x256xf32>
    %80 = tpu.matmul %77, %79, %cst_57 {dimension_numbers = #tpu.dot_dimension_numbers<[1], [0], [0], [1], [0, 0, 1, 1], [], []>} : vector<4x128xbf16>, vector<128x256xbf16>, vector<4x256xf32> -> vector<4x256xf32>
    %81 = arith.truncf %70 : vector<4x128xf32> to vector<4x128xbf16>
    %c1_58 = arith.constant 1 : index
    %c0_59 = arith.constant 0 : index
    %c0_60 = arith.constant 0 : index
    %82 = vector.load %arg12[%c1_58, %c0_59, %c0_60] : memref<3x128x256xbf16, #tpu.memory_space<vmem>>, vector<1x128x256xbf16>
    %83 = vector.shape_cast %82 : vector<1x128x256xbf16> to vector<128x256xbf16>
    %cst_61 = arith.constant dense<0.000000e+00> : vector<4x256xf32>
    %84 = tpu.matmul %81, %83, %cst_61 {dimension_numbers = #tpu.dot_dimension_numbers<[1], [0], [0], [1], [0, 0, 1, 1], [], []>} : vector<4x128xbf16>, vector<128x256xbf16>, vector<4x256xf32> -> vector<4x256xf32>
    %85 = arith.addf %80, %84 : vector<4x256xf32>
    %86 = vector.extract_strided_slice %70 {offsets = [1, 0], sizes = [3, 128], strides = [1, 1]} : vector<4x128xf32> to vector<3x128xf32>
    %87 = tpu.concatenate %86, %74 in 0 : vector<3x128xf32>, vector<1x128xf32> -> vector<4x128xf32>
    %88 = arith.truncf %87 : vector<4x128xf32> to vector<4x128xbf16>
    %c2_62 = arith.constant 2 : index
    %c0_63 = arith.constant 0 : index
    %c0_64 = arith.constant 0 : index
    %89 = vector.load %arg12[%c2_62, %c0_63, %c0_64] : memref<3x128x256xbf16, #tpu.memory_space<vmem>>, vector<1x128x256xbf16>
    %90 = vector.shape_cast %89 : vector<1x128x256xbf16> to vector<128x256xbf16>
    %cst_65 = arith.constant dense<0.000000e+00> : vector<4x256xf32>
    %91 = tpu.matmul %88, %90, %cst_65 {dimension_numbers = #tpu.dot_dimension_numbers<[1], [0], [0], [1], [0, 0, 1, 1], [], []>} : vector<4x128xbf16>, vector<128x256xbf16>, vector<4x256xf32> -> vector<4x256xf32>
    %92 = arith.addf %85, %91 : vector<4x256xf32>
    %c0_66 = arith.constant 0 : index
    %c0_67 = arith.constant 0 : index
    %93 = vector.load %arg13[%c0_66, %c0_67] : memref<1x256xf32, #tpu.memory_space<vmem>>, vector<1x256xf32>
    %94 = vector.broadcast %93 : vector<1x256xf32> to vector<4x256xf32>
    %95 = arith.mulf %92, %94 : vector<4x256xf32>
    %c0_68 = arith.constant 0 : index
    %c0_69 = arith.constant 0 : index
    %96 = vector.load %arg14[%c0_68, %c0_69] : memref<1x256xf32, #tpu.memory_space<vmem>>, vector<1x256xf32>
    %97 = vector.broadcast %96 : vector<1x256xf32> to vector<4x256xf32>
    %98 = arith.addf %95, %97 : vector<4x256xf32>
    %cst_70 = arith.constant 0.000000e+00 : f32
    %99 = vector.broadcast %cst_70 : f32 to vector<4x256xf32>
    %100 = arith.maximumf %98, %99 : vector<4x256xf32>
    %c0_71 = arith.constant 0 : index
    %c0_72 = arith.constant 0 : index
    %101 = vector.load %arg15[%c0_71, %c0_72] : memref<2x4xbf16, #tpu.memory_space<vmem>>, vector<2x4xbf16>
    %102 = arith.truncf %100 : vector<4x256xf32> to vector<4x256xbf16>
    %cst_73 = arith.constant dense<0.000000e+00> : vector<2x256xf32>
    %103 = tpu.matmul %101, %102, %cst_73 {dimension_numbers = #tpu.dot_dimension_numbers<[1], [0], [0], [1], [0, 0, 1, 1], [], []>} : vector<2x4xbf16>, vector<4x256xbf16>, vector<2x256xf32> -> vector<2x256xf32>
    %104 = arith.truncf %103 : vector<2x256xf32> to vector<2x256xbf16>
    %c0_74 = arith.constant 0 : index
    %c0_75 = arith.constant 0 : index
    %105 = vector.load %arg16[%c0_74, %c0_75] : memref<256x128xbf16, #tpu.memory_space<vmem>>, vector<256x128xbf16>
    %cst_76 = arith.constant dense<0.000000e+00> : vector<2x128xf32>
    %106 = tpu.matmul %104, %105, %cst_76 {dimension_numbers = #tpu.dot_dimension_numbers<[1], [0], [0], [1], [0, 0, 1, 1], [], []>} : vector<2x256xbf16>, vector<256x128xbf16>, vector<2x128xf32> -> vector<2x128xf32>
    %c0_77 = arith.constant 0 : index
    %c0_78 = arith.constant 0 : index
    %c0_79 = arith.constant 0 : index
    %107 = vector.load %arg19[%c0_77, %c0_78, %c0_79] : memref<1x2x128xf32, #tpu.memory_space<vmem>>, vector<1x2x128xf32>
    %108 = vector.shape_cast %107 : vector<1x2x128xf32> to vector<2x128xf32>
    %109 = vector.shape_cast %106 : vector<2x128xf32> to vector<1x2x128xf32>
    tpu.vector_store %arg19[%c0_77, %c0_78, %c0_79], %109 {strides = array<i32>} : memref<1x2x128xf32, #tpu.memory_space<vmem>>, vector<1x2x128xf32>,
    return
  }
  func.func @transform_0(%arg0: i32) -> (i32, i32, i32) {
    %c0_i32 = arith.constant 0 : i32
    %c0_i32_0 = arith.constant 0 : i32
    %c0_i32_1 = arith.constant 0 : i32
    return %arg0, %c0_i32, %c0_i32_0 : i32, i32, i32
  }
  func.func @transform_1(%arg0: i32) -> (i32, i32, i32) {
    %c0_i32 = arith.constant 0 : i32
    %c0_i32_0 = arith.constant 0 : i32
    %c0_i32_1 = arith.constant 0 : i32
    %c0_i32_2 = arith.constant 0 : i32
    return %c0_i32, %c0_i32_0, %c0_i32_1 : i32, i32, i32
  }
  func.func @transform_2(%arg0: i32) -> (i32, i32) {
    %c0_i32 = arith.constant 0 : i32
    %c0_i32_0 = arith.constant 0 : i32
    %c0_i32_1 = arith.constant 0 : i32
    return %c0_i32, %c0_i32_0 : i32, i32
  }
  func.func @transform_3(%arg0: i32) -> (i32, i32) {
    %c0_i32 = arith.constant 0 : i32
    %c0_i32_0 = arith.constant 0 : i32
    %c0_i32_1 = arith.constant 0 : i32
    return %c0_i32, %c0_i32_0 : i32, i32
  }
  func.func @transform_4(%arg0: i32) -> (i32, i32) {
    %c0_i32 = arith.constant 0 : i32
    %c0_i32_0 = arith.constant 0 : i32
    %c0_i32_1 = arith.constant 0 : i32
    return %c0_i32, %c0_i32_0 : i32, i32
  }
  func.func @transform_5(%arg0: i32) -> (i32, i32) {
    %c0_i32 = arith.constant 0 : i32
    %c0_i32_0 = arith.constant 0 : i32
    %c0_i32_1 = arith.constant 0 : i32
    return %c0_i32, %c0_i32_0 : i32, i32
  }
  func.func @transform_6(%arg0: i32) -> (i32, i32, i32) {
    %c0_i32 = arith.constant 0 : i32
    %c0_i32_0 = arith.constant 0 : i32
    %c0_i32_1 = arith.constant 0 : i32
    %c0_i32_2 = arith.constant 0 : i32
    return %c0_i32, %c0_i32_0, %c0_i32_1 : i32, i32, i32
  }
  func.func @transform_7(%arg0: i32) -> (i32, i32) {
    %c0_i32 = arith.constant 0 : i32
    %c0_i32_0 = arith.constant 0 : i32
    %c0_i32_1 = arith.constant 0 : i32
    return %c0_i32, %c0_i32_0 : i32, i32
  }
  func.func @transform_8(%arg0: i32) -> (i32, i32) {
    %c0_i32 = arith.constant 0 : i32
    %c0_i32_0 = arith.constant 0 : i32
    %c0_i32_1 = arith.constant 0 : i32
    return %c0_i32, %c0_i32_0 : i32, i32
  }
  func.func @transform_9(%arg0: i32) -> (i32, i32) {
    %c0_i32 = arith.constant 0 : i32
    %c0_i32_0 = arith.constant 0 : i32
    %c0_i32_1 = arith.constant 0 : i32
    return %c0_i32, %c0_i32_0 : i32, i32
  }
  func.func @transform_10(%arg0: i32) -> (i32, i32) {
    %c0_i32 = arith.constant 0 : i32
    %c0_i32_0 = arith.constant 0 : i32
    %c0_i32_1 = arith.constant 0 : i32
    return %c0_i32, %c0_i32_0 : i32, i32
  }
  func.func @transform_11(%arg0: i32) -> (i32, i32, i32) {
    %c0_i32 = arith.constant 0 : i32
    %c0_i32_0 = arith.constant 0 : i32
    %c0_i32_1 = arith.constant 0 : i32
    %c0_i32_2 = arith.constant 0 : i32
    return %c0_i32, %c0_i32_0, %c0_i32_1 : i32, i32, i32
  }
  func.func @transform_12(%arg0: i32) -> (i32, i32) {
    %c0_i32 = arith.constant 0 : i32
    %c0_i32_0 = arith.constant 0 : i32
    %c0_i32_1 = arith.constant 0 : i32
    return %c0_i32, %c0_i32_0 : i32, i32
  }
  func.func @transform_13(%arg0: i32) -> (i32, i32) {
    %c0_i32 = arith.constant 0 : i32
    %c0_i32_0 = arith.constant 0 : i32
    %c0_i32_1 = arith.constant 0 : i32
    return %c0_i32, %c0_i32_0 : i32, i32
  }
  func.func @transform_14(%arg0: i32) -> (i32, i32) {
    %c0_i32 = arith.constant 0 : i32
    %c0_i32_0 = arith.constant 0 : i32
    %c0_i32_1 = arith.constant 0 : i32
    return %c0_i32, %c0_i32_0 : i32, i32
  }
  func.func @transform_15(%arg0: i32) -> (i32, i32) {
    %c0_i32 = arith.constant 0 : i32
    %c0_i32_0 = arith.constant 0 : i32
    %c0_i32_1 = arith.constant 0 : i32
    return %c0_i32, %c0_i32_0 : i32, i32
  }
  func.func @transform_16(%arg0: i32) -> (i32, i32, i32) {
    %c0_i32 = arith.constant 0 : i32
    %c0_i32_0 = arith.constant 0 : i32
    %c0_i32_1 = arith.constant 0 : i32
    return %arg0, %c0_i32, %c0_i32_0 : i32, i32, i32
  }
  func.func @transform_17(%arg0: i32) -> (i32, i32, i32) {
    %c0_i32 = arith.constant 0 : i32
    %c0_i32_0 = arith.constant 0 : i32
    %c0_i32_1 = arith.constant 0 : i32
    return %arg0, %c0_i32, %c0_i32_0 : i32, i32, i32
  }
  func.func @transform_18(%arg0: i32) -> (i32, i32, i32) {
    %c0_i32 = arith.constant 0 : i32
    %c0_i32_0 = arith.constant 0 : i32
    %c0_i32_1 = arith.constant 0 : i32
    return %arg0, %c0_i32, %c0_i32_0 : i32, i32, i32
  }
}

</mosaic_0001>

<bundles_post_ra>
// kernel: tpu_custom_call.1
= control target key start
LH: loop header
LB: loop body
LE: loop exit
PB: predicated region body
PF: predicated region fallthrough
CT: control target
= control target key end

     0   :  { %s4491_s0 = inlined_call_operand.hbm [shape: f32[2,16,64], index: 0, kind: input, shape index: {}]   ;;  %s4492_s1 = inlined_call_operand.hbm [shape: bf16[3,64,256], index: 1, kind: input, shape index: {}]   ;;  %s4493_s2 = inlined_call_operand.vmem [shape: f32[1,256], index: 2, kind: input, shape index: {}]   ;;  %s4494_s3 = inlined_call_operand.vmem [shape: f32[1,256], index: 3, kind: input, shape index: {}]   ;;  %s4495_s4 = inlined_call_operand.vmem [shape: bf16[8,16], index: 4, kind: input, shape index: {}]   ;;  %s4496_s5 = inlined_call_operand.hbm [shape: bf16[256,128], index: 5, kind: input, shape index: {}]   ;;  %s4497_s6 = inlined_call_operand.hbm [shape: bf16[3,128,256], index: 6, kind: input, shape index: {}]   ;;  %s4498_s7 = inlined_call_operand.vmem [shape: f32[1,256], index: 7, kind: input, shape index: {}]   ;;  %s4499_s8 = inlined_call_operand.vmem [shape: f32[1,256], index: 8, kind: input, shape index: {}]   ;;  %s4500_s9 = inlined_call_operand.vmem [shape: bf16[4,8], index: 9, kind: input, shape index: {}]   ;;  %s4501_s10 = inlined_call_operand.hbm [shape: bf16[256,128], index: 10, kind: input, shape index: {}]   ;;  %s4502_s11 = inlined_call_operand.hbm [shape: bf16[3,128,256], index: 11, kind: input, shape index: {}]   ;;  %s4503_s12 = inlined_call_operand.vmem [shape: f32[1,256], index: 12, kind: input, shape index: {}]   ;;  %s4504_s13 = inlined_call_operand.vmem [shape: f32[1,256], index: 13, kind: input, shape index: {}]   ;;  %s4505_s14 = inlined_call_operand.vmem [shape: bf16[2,4], index: 14, kind: input, shape index: {}]   ;;  %s4506_s15 = inlined_call_operand.hbm [shape: bf16[256,128], index: 15, kind: input, shape index: {}]   ;;  %s4507_s16 = inlined_call_operand.hbm [shape: f32[2,8,128], index: 16, kind: output, shape index: {0}]   ;;  %s4508_s17 = inlined_call_operand.hbm [shape: f32[2,4,128], index: 17, kind: output, shape index: {1}]   ;;  %s4509_s18 = inlined_call_operand.hbm [shape: f32[2,2,128], index: 18, kind: output, shape index: {2}]  }
   0x1   :  { %4522 = sst [smem:[#allocation24_spill]] %s4491_s0 }
   0x2   :  { %4523 = sst [smem:[#allocation25_spill]] %s4492_s1 }
   0x3   :  { %4524 = sst [smem:[#allocation26_spill]] %s4493_s2 }
   0x4   :  { %4525 = sst [smem:[#allocation27_spill]] %s4494_s3 }
   0x5   :  { %4526 = sst [smem:[#allocation28_spill]] %s4495_s4 }
   0x6   :  { %4527 = sst [smem:[#allocation29_spill]] %s4496_s5 }
   0x7   :  { %4528 = sst [smem:[#allocation30_spill]] %s4497_s6 }
   0x8   :  { %4529 = sst [smem:[#allocation31_spill]] %s4499_s8 }
   0x9   :  { %4530 = sst [smem:[#allocation32_spill]] %s4500_s9 }
   0xa   :  { %4531 = sst [smem:[#allocation33_spill]] %s4503_s12 }
   0xb   :  { %4532 = sst [smem:[#allocation34_spill]] %s4504_s13 }
   0xc   :  { %4533 = sst [smem:[#allocation35_spill]] %s4505_s14 }
   0xd   :  { %4534 = sst [smem:[#allocation36_spill]] %s4507_s16 }
   0xe   :  { %4535 = sst [smem:[#allocation37_spill]] %s4508_s17 }
   0xf   :  { %4536 = sst [smem:[#allocation38_spill]] %s4509_s18 }
  0x10   :  { %24 = vsyncpa [#allocation3], 0 }
  0x11   :  { %26 = vsyncpa [#allocation3 + $0x1], 0 }
  0x12   :  { %27 = vsyncpa [#allocation6], 0 }
  0x13   :  { %28 = vsyncpa [#allocation9], 0 }
  0x14   :  { %29 = vsyncpa [#allocation12], 0 }
  0x15   :  { %30 = vsyncpa [#allocation4], 0 }
  0x16   :  { %32 = vsyncpa [#allocation4 + $0x1], 0 }
  0x17   :  { %33 = vsyncpa [#allocation16], 0 }
  0x18   :  { %35 = vsyncpa [#allocation16 + $0x1], 0  ;;  %s3978_s27 = smov 0   ;;  %s3980_s28 = smov 0  }
  0x19   :  { %s3982_s29 = smov 0   ;;  %s3984_s30 = smov 0  }
  0x1a LB: > { %s3868_s0 = smov [#allocation5]   ;;  %s3999_s1 = sadd.s32 4294967295, %s3866_s30   ;;  %s3866_s30 = sphi %s3984_s30, %s4579_s30   ;;  %s3862_s29 = sphi %s3982_s29, %s4578_s29   ;;  %s3858_s28 = sphi %s3980_s28, %s4577_s28   ;;  %s3854_s27 = sphi %s3978_s27, %s4576_s27  }
  0x1b   : > { %s477_s19 = sshll.u32 %s3868_s0, 4  ;;  %p2867_p0 = scmp.ge.s32.totalorder %s3866_s30, 1  ;;  %s4004_s19 = int_to_ptr.vmem [resolvable:$true] %s477_s19 }
  0x1c   : > { %p4515_p1 = scmp.eq.s32.totalorder %s3999_s1, 0  ;;  %p465_p2 = scmp.lt.s32.totalorder %s3866_s30, 3 }
  0x1d   : > { %s3869_s21 = smov [#allocation8]   ;;  %s3870_s23 = smov [#allocation11]  }
  0x1e   : > { %p4006_p3 = pnand %p2867_p0, %p465_p2  ;;  %s512_s22 = sshll.u32 %s3869_s21, 4  ;;  %s4019_s22 = int_to_ptr.vmem [resolvable:$true] %s512_s22 }
  0x1f   : > { %s547_s24 = sshll.u32 %s3870_s23, 4  ;;  %s4539_s0 = sld [smem:[#allocation25_spill]]  ;;  %s4021_s24 = int_to_ptr.vmem [resolvable:$true] %s547_s24 }
  0x20   : > { %s4537_s20 = scalar_select %p4006_p3, 1, 0 }
  0x21   : > { %p3212_p5 = pneg %p4006_p3 }
  0x23   : > { %p4015_p6 = pnand %p3212_p5, %p4515_p1 }
  0x25   : > { %s3530_s18 = scalar_lea.hbm %s4539_s0, 3072  ;;  %p4031_p8 = pneg %p4015_p6 }
  0x26   : > { %p3531_p7 = scmp.ne.s32.totalorder %s4539_s0, %s3530_s18  ;;  %p3537_p11 = scmp.lt.u32.totalorder %s3530_s18, %s4539_s0 }
  0x28   : > { %p3533_p9 = pnand %p4031_p8, %p3531_p7 }
  0x2a   : > { %p3534_p10 = pneg %p3533_p9 }
  0x2c   : > { %p3539_p12 = pnand %p3537_p11, %p3534_p10 }
  0x2e   : > { %3542 = shalt.err (!%p3539_p12)
}
  0x2f   : > { %s3543_s16 = scalar_lea.vmem %s4004_s19, 3072  ;;  %p3551_p5 = scmp.lt.s32.totalorder %s4004_s19, %s4004_s19 }
  0x30   : > { %p3544_p13 = scmp.ne.s32.totalorder %s4004_s19, %s3543_s16  ;;  %p3552_p4 = scmp.lt.s32.totalorder %s3543_s16, %s3543_s16 }
  0x32   : > { %p3546_p0 = pnand %p3544_p13, %p4031_p8  ;;  %p3553_p7 = por %p3552_p4, %p3551_p5 }
  0x34   : > { %p3547_p2 = pneg %p3546_p0 }
  0x36   : > { %p3554_p9 = pnand %p3553_p7, %p3547_p2 }
  0x38   : > { %3557 = shalt.err (!%p3554_p9)
}
  0x39   : > { %s4517_s17 = smov 128   ;;  %s4518_s14 = smov 8  }
  0x3a   : > { %3215 = dma.hbm_to_vmem [thread:$0]  (!%p4015_p6), %s4539_s0, 3072, %s4004_s19, [#allocation6], %s4517_s17, %s4517_s17, %s4518_s14  }
  0x3b   : > { %s4541_s6 = sld [smem:[#allocation30_spill]] }
  0x41   : > { %s3558_s16 = scalar_lea.hbm %s4541_s6, 6144 }
  0x42   : > { %p3559_p4 = scmp.ne.s32.totalorder %s4541_s6, %s3558_s16  ;;  %p3565_p12 = scmp.lt.u32.totalorder %s3558_s16, %s4541_s6 }
  0x44   : > { %p3561_p10 = pnand %p3559_p4, %p4031_p8 }
  0x46   : > { %p3562_p11 = pneg %p3561_p10 }
  0x48   : > { %p3567_p13 = pnand %p3565_p12, %p3562_p11 }
  0x4a   : > { %3570 = shalt.err (!%p3567_p13)
}
  0x4b   : > { %s3571_s19 = scalar_lea.vmem %s4019_s22, 6144  ;;  %p3579_p7 = scmp.lt.s32.totalorder %s4019_s22, %s4019_s22 }
  0x4c   : > { %p3572_p0 = scmp.ne.s32.totalorder %s4019_s22, %s3571_s19  ;;  %p3580_p9 = scmp.lt.s32.totalorder %s3571_s19, %s3571_s19 }
  0x4e   : > { %p3574_p2 = pnand %p3572_p0, %p4031_p8  ;;  %p3581_p4 = por %p3580_p9, %p3579_p7 }
  0x50   : > { %p3575_p5 = pneg %p3574_p2 }
  0x52   : > { %p3582_p10 = pnand %p3581_p4, %p3575_p5 }
  0x54   : > { %3585 = shalt.err (!%p3582_p10)
}
  0x55   : > { %3221 = dma.hbm_to_vmem [thread:$0]  (!%p4015_p6), %s4541_s6, 6144, %s4019_s22, [#allocation9], %s4517_s17, %s4517_s17, %s4518_s14  }
  0x56   : > { %s3586_s18 = scalar_lea.hbm %s4502_s11, 6144 }
  0x57   : > { %p3587_p11 = scmp.ne.s32.totalorder %s4502_s11, %s3586_s18  ;;  %p3593_p0 = scmp.lt.u32.totalorder %s3586_s18, %s4502_s11 }
  0x59   : > { %p3589_p12 = pnand %p3587_p11, %p4031_p8 }
  0x5b   : > { %p3590_p13 = pneg %p3589_p12 }
  0x5d   : > { %p3595_p2 = pnand %p3593_p0, %p3590_p13 }
  0x5f   : > { %3598 = shalt.err (!%p3595_p2)
}
  0x60   : > { %s3599_s22 = scalar_lea.vmem %s4021_s24, 6144  ;;  %p3607_p4 = scmp.lt.s32.totalorder %s4021_s24, %s4021_s24 }
  0x61   : > { %p3600_p5 = scmp.ne.s32.totalorder %s4021_s24, %s3599_s22  ;;  %p3608_p10 = scmp.lt.s32.totalorder %s3599_s22, %s3599_s22 }
  0x63   : > { %p3602_p7 = pnand %p3600_p5, %p4031_p8  ;;  %p3609_p11 = por %p3608_p10, %p3607_p4 }
  0x65   : > { %p3603_p9 = pneg %p3602_p7 }
  0x67   : > { %p3610_p12 = pnand %p3609_p11, %p3603_p9 }
  0x69   : > { %3613 = shalt.err (!%p3610_p12)
}
  0x6a   : > { %3227 = dma.hbm_to_vmem [thread:$0]  (!%p4015_p6), %s4502_s11, 6144, %s4021_s24, [#allocation12], %s4517_s17, %s4517_s17, %s4518_s14  }
  0x6b   : > { %s3873_s9 = smov [#allocation7]   ;;  %s4542_s5 = sld [smem:[#allocation29_spill]] }
  0x6c   : > { %s499_s12 = sshll.u32 %s3873_s9, 4  ;;  %s500_s12 = int_to_ptr.vmem [resolvable:$true] %s499_s12 }
  0x71   : > { %s3614_s25 = scalar_lea.hbm %s4542_s5, 2048 }
  0x72   : > { %p3615_p13 = scmp.ne.s32.totalorder %s4542_s5, %s3614_s25  ;;  %p3621_p5 = scmp.lt.u32.totalorder %s3614_s25, %s4542_s5 }
  0x74   : > { %p3617_p0 = pnand %p3615_p13, %p4031_p8 }
  0x76   : > { %p3618_p2 = pneg %p3617_p0 }
  0x78   : > { %p3623_p7 = pnand %p3621_p5, %p3618_p2 }
  0x7a   : > { %3626 = shalt.err (!%p3623_p7)
}
  0x7b   : > { %s3627_s24 = scalar_lea.vmem %s500_s12, 2048  ;;  %p3635_p11 = scmp.lt.s32.totalorder %s500_s12, %s500_s12 }
  0x7c   : > { %p3628_p9 = scmp.ne.s32.totalorder %s500_s12, %s3627_s24  ;;  %p3636_p12 = scmp.lt.s32.totalorder %s3627_s24, %s3627_s24 }
  0x7e   : > { %p3630_p4 = pnand %p3628_p9, %p4031_p8  ;;  %p3637_p1 = por %p3636_p12, %p3635_p11 }
  0x80   : > { %p3631_p10 = pneg %p3630_p4 }
  0x82   : > { %p3638_p3 = pnand %p3637_p1, %p3631_p10 }
  0x84   : > { %3641 = shalt.err (!%p3638_p3)
}
  0x85   : > { %s3874_s19 = smov 64   ;;  %s3875_s8 = smov 4  }
  0x86   : > { %3218 = dma.hbm_to_vmem [thread:$0]  (!%p4015_p6), %s4542_s5, 2048, %s500_s12, [#allocation6], %s3874_s19, %s3874_s19, %s3875_s8  }
  0x87   : > { %s3876_s18 = smov [#allocation10]   ;;  %s3877_s26 = smov [#allocation13]  }
  0x88   : > { %s534_s25 = sshll.u32 %s3876_s18, 4  ;;  %s569_s23 = sshll.u32 %s3877_s26, 4  ;;  %s535_s25 = int_to_ptr.vmem [resolvable:$true] %s534_s25  ;;  %s4128_s23 = int_to_ptr.vmem [resolvable:$true] %s569_s23 }
  0x89   : > { %s3642_s24 = scalar_lea.hbm %s4501_s10, 2048 }
  0x8a   : > { %p3643_p1 = scmp.ne.s32.totalorder %s4501_s10, %s3642_s24  ;;  %p3649_p0 = scmp.lt.u32.totalorder %s3642_s24, %s4501_s10 }
  0x8c   : > { %p3645_p3 = pnand %p3643_p1, %p4031_p8 }
  0x8e   : > { %p3646_p13 = pneg %p3645_p3 }
  0x90   : > { %p3651_p2 = pnand %p3649_p0, %p3646_p13 }
  0x92   : > { %3654 = shalt.err (!%p3651_p2)
}
  0x93   : > { %s3655_s13 = scalar_lea.vmem %s535_s25, 2048  ;;  %p3663_p4 = scmp.lt.s32.totalorder %s535_s25, %s535_s25 }
  0x94   : > { %p3656_p5 = scmp.ne.s32.totalorder %s535_s25, %s3655_s13  ;;  %p3664_p10 = scmp.lt.s32.totalorder %s3655_s13, %s3655_s13 }
  0x96   : > { %p3658_p7 = pnand %p3656_p5, %p4031_p8  ;;  %p3665_p11 = por %p3664_p10, %p3663_p4 }
  0x98   : > { %p3659_p9 = pneg %p3658_p7 }
  0x9a   : > { %p3666_p12 = pnand %p3665_p11, %p3659_p9 }
  0x9c   : > { %3669 = shalt.err (!%p3666_p12)
}
  0x9d   : > { %3224 = dma.hbm_to_vmem [thread:$0]  (!%p4015_p6), %s4501_s10, 2048, %s535_s25, [#allocation9], %s3874_s19, %s3874_s19, %s3875_s8  }
  0x9e   : > { %s3670_s16 = scalar_lea.hbm %s4506_s15, 2048 }
  0x9f   : > { %p3671_p1 = scmp.ne.s32.totalorder %s4506_s15, %s3670_s16  ;;  %p3677_p0 = scmp.lt.u32.totalorder %s3670_s16, %s4506_s15 }
  0xa1   : > { %p3673_p3 = pnand %p3671_p1, %p4031_p8 }
  0xa3   : > { %p3674_p13 = pneg %p3673_p3 }
  0xa5   : > { %p3679_p2 = pnand %p3677_p0, %p3674_p13 }
  0xa7   : > { %3682 = shalt.err (!%p3679_p2)
}
  0xa8   : > { %s3683_s25 = scalar_lea.vmem %s4128_s23, 2048  ;;  %p3691_p4 = scmp.lt.s32.totalorder %s4128_s23, %s4128_s23 }
  0xa9   : > { %p3684_p5 = scmp.ne.s32.totalorder %s4128_s23, %s3683_s25  ;;  %p3692_p10 = scmp.lt.s32.totalorder %s3683_s25, %s3683_s25 }
  0xab   : > { %p3686_p7 = pnand %p3684_p5, %p4031_p8  ;;  %p3693_p11 = por %p3692_p10, %p3691_p4 }
  0xad   : > { %p3687_p9 = pneg %p3686_p7 }
  0xaf   : > { %p3694_p12 = pnand %p3693_p11, %p3687_p9 }
  0xb1   : > { %3697 = shalt.err (!%p3694_p12)
}
  0xb2   : > { %3230 = dma.hbm_to_vmem [thread:$0]  (!%p4015_p6), %s4506_s15, 2048, %s4128_s23, [#allocation12], %s3874_s19, %s3874_s19, %s3875_s8  }
  0xb3   : > { %s4519_s2 = sadd.s32 4294967294, %s3866_s30   ;;  %s4179_s21 = sadd.s32 1, %s3866_s30  }
  0xb4   : > { %s45_s14 = ssub.s32 %s3866_s30, %s4179_s21  ;;  %s48_s18 = sadd.s32 1, %s3862_s29 }
  0xb5   : > { %p46_p8 = scmp.eq.s32.totalorder %s45_s14, 0  ;;  %p55_p1 = scmp.ne.s32.totalorder %s3862_s29, %s3858_s28 }
  0xb6   : > { %p56_p3 = scmp.eq.s32.totalorder %s3866_s30, 0  ;;  %p61_p13 = scmp.ne.s32.totalorder %s3858_s28, %s3854_s27 }
  0xb7   : > { %s4190_s26 = scalar_select %p46_p8, %s3862_s29, %s48_s18  }
  0xb8   : > { %p4192_p0 = por %p56_p3, %p55_p1  ;;  %p4544_p2 = scmp.eq.s32.totalorder %s3999_s1, 0 }
  0xb9   : > { %p400_p5 = scmp.eq.s32.totalorder %s3999_s1, 1  ;;  %p406_p7 = scmp.eq.s32.totalorder %s4519_s2, 1 }
  0xba   : > { %p4198_p6 = por %p4544_p2, %p61_p13  ;;  %p3251_p9 = scmp.lt.s32.totalorder %s3866_s30, 2 }
  0xbb   : > { %s583_s8 = sand.u32 1, %s3862_s29   ;;  %p4207_p4 = por %p400_p5, %p55_p1 }
  0xbc   : > { %p4211_p10 = por %p406_p7, %p61_p13  ;;  %s2875_s24 = sshll.u32 %s583_s8, 4 }
  0xbd   : > { %s4546_s23 = scalar_select %p4207_p4, 1, 0 }
  0xbe   : > { %s4547_s22 = scalar_select %p4211_p10, 1, 0 }
  0xbf   : > { %s3089_s9 = sshll.u32 %s3866_s30, 8  ;;  %s4548_s13 = sld [smem:[#allocation24_spill]] }
  0xc0   : > { %s587_s14 = scalar_lea.vmem [#allocation2], %s2875_s24  ;;  %p4225_p11 = pnand %p3251_p9, %p4192_p0 }
  0xc1   : > { %s594_s18 = sshll.u32 %s587_s14, 4  ;;  %s4229_s0 = scalar_lea.sflag [#allocation3], %s583_s8  ;;  %s4221_s18 = int_to_ptr.vmem [resolvable:$true] %s594_s18 }
  0xc2   : > { %p3700_p8 = pneg %p4225_p11 }
  0xc5   : > { %s4219_s17 = scalar_lea.hbm %s4548_s13, %s3089_s9  ;;  %s3703_s16 = scalar_lea.hbm %s4548_s13, 512 }
  0xc6   : > { %s3698_s12 = scalar_lea.hbm %s4219_s17, 256  ;;  %p3704_p13 = scmp.lt.u32.totalorder %s4219_s17, %s4548_s13 }
  0xc7   : > { %p3699_p12 = scmp.ne.s32.totalorder %s4219_s17, %s3698_s12  ;;  %p3705_p0 = scmp.lt.u32.totalorder %s3703_s16, %s3698_s12 }
  0xc8   : > { %p3707_p5 = scmp.lt.u32.totalorder %s3698_s12, %s4219_s17 }
  0xc9   : > { %p3701_p1 = pnand %p3700_p8, %p3699_p12  ;;  %p3706_p2 = por %p3705_p0, %p3704_p13 }
  0xcb   : > { %p3702_p3 = pneg %p3701_p1  ;;  %p3708_p7 = por %p3707_p5, %p3706_p2 }
  0xcd   : > { %p3709_p9 = pnand %p3708_p7, %p3702_p3 }
  0xcf   : > { %3712 = shalt.err (!%p3709_p9)
}
  0xd0   : > { %s3713_s8 = scalar_lea.vmem %s4221_s18, 256  ;;  %s3878_s24 = smov [#allocation2]  }
  0xd1   : > { %p3714_p12 = scmp.ne.s32.totalorder %s4221_s18, %s3713_s8  ;;  %s3718_s9 = sshll.u32 %s3878_s24, 4  ;;  %s3719_s9 = int_to_ptr.vmem [resolvable:$false] %s3718_s9 }
  0xd2   : > { %s3720_s25 = scalar_lea.vmem %s3719_s9, 512  ;;  %p3721_p4 = scmp.lt.s32.totalorder %s4221_s18, %s3719_s9 }
  0xd3   : > { %p3716_p1 = pnand %p3714_p12, %p3700_p8  ;;  %p3722_p13 = scmp.lt.s32.totalorder %s3720_s25, %s3713_s8 }
  0xd5   : > { %p3717_p10 = pneg %p3716_p1  ;;  %p3723_p0 = por %p3722_p13, %p3721_p4 }
  0xd7   : > { %p3724_p2 = pnand %p3723_p0, %p3717_p10 }
  0xd9   : > { %3727 = shalt.err (!%p3724_p2)
}
  0xda   : > { %s4550_s12 = smov 8   ;;  %s4551_s16 = smov 128  }
  0xdb   : > { %3234 = dma.hbm_to_vmem [thread:$0]  (!%p4225_p11), %s4219_s17, 256, %s4221_s18, %s4229_s0, %s4551_s16, %s4551_s16, %s4550_s12  }
  0xdc   : > { %p4552_p8 = scmp.ne.s32.totalorder %s4537_s20, 0 }
  0xdd   : > { %s4263_s14 = sand.u32 (!%p4552_p8), 1, %s3858_s28  }
  0xde   : > { %606 = sbr.rel (%p4552_p8) target bundleno = 2406 (0x966), region = 84  ;;  %s2879_s8 = sshll.u32 (!%p4552_p8), %s4263_s14, 4 }
  0xdf   : > { %s609_s24 = scalar_lea.sflag (!%p4552_p8), [#allocation3], %s4263_s14  ;;  %s612_s9 = scalar_lea.vmem (!%p4552_p8), [#allocation2], %s2879_s8 }
  0xe5   : > { %3829 = dma.done.wait (%p4198_p6), %s609_s24, 256  }
  0xe6   : > { %3831 = vsyncadd (%p4198_p6), %s609_s24, 4294967040  ;;  %p4553_p4 = scmp.eq.s32.totalorder %s3999_s1, 0 }
  0xe8   : > { %3833 = dma.done.wait (%p4553_p4), [#allocation6], 5120   ;;  %p4554_p10 = pmov %p4553_p4 }
  0xe9   : > { %p4555_p11 = pmov %p4553_p4 }
  0xea   : > { %3835 = vsyncadd (%p4554_p10), [#allocation6], 4294962176 }
  0xeb   : > { %3837 = dma.done.wait (%p4555_p11), [#allocation9], 8192   ;;  %p4556_p3 = pmov %p4553_p4 }
  0xed   : > { %3839 = vsyncadd (%p4556_p3), [#allocation9], 4294959104  ;;  %p4557_p5 = pmov %p4556_p3 }
  0xee   : > { %p4558_p7 = pmov %p4556_p3 }
  0xef   : > { %3841 = dma.done.wait (%p4557_p5), [#allocation12], 8192  }
  0xf0   : > { %3843 = vsyncadd (%p4558_p7), [#allocation12], 4294959104  ;;  %v3879_v0 = vmov 0   ;;  %v3302_v1 = vld [vmem:[#allocation5 + $0x44] ss:$8 sps:$4 sm:$0xff]   ;;  %vm770_vm0 = vcmask 523264   ;;  %v1012_v38 = vlaneseq }
  0xf1   : > { %806 = vmatprep.mubr.bf16.mxu0 %v3879_v0  ;;  %1085 = vmatprep.mubr.bf16.mxu1 %v3879_v0  ;;  %v3304_v2 = vld [vmem:[#allocation5 + $0x40] ss:$8 sps:$4 sm:$0xff]   ;;  %v3305_v3 = vld [vmem:[#allocation5 + $0x54] ss:$8 sps:$4 sm:$0xff]   ;;  %v3307_v4 = vld [vmem:[#allocation5 + $0x50] ss:$8 sps:$4 sm:$0xff]  }
  0xf2   : > { %774 = vmatprep.subr.bf16.mxu0 %v3302_v1  ;;  %v3308_v5 = vld [vmem:[#allocation5 + $0x64] ss:$8 sps:$4 sm:$0xff]   ;;  %v3310_v6 = vld [vmem:[#allocation5 + $0x60] ss:$8 sps:$4 sm:$0xff]   ;;  %v3311_v7 = vld [vmem:[#allocation5 + $0x74] ss:$8 sps:$4 sm:$0xff]  }
  0xf3   : > { %775 = vmatpush1.bf16.msra.mxu0 %v3304_v2  ;;  %v3313_v8 = vld [vmem:[#allocation5 + $0x70] ss:$8 sps:$4 sm:$0xff]   ;;  %v3316_v11 = vld [vmem:[#allocation5 + $0x4] ss:$8 sps:$4 sm:$0xff]   ;;  %v3314_v13 = vld [vmem:[#allocation5] ss:$8 sps:$4 sm:$0xff]  }
  0xf4   : > { %776 = vmatprep.subr.bf16.mxu0 %v3305_v3  ;;  %v700_v9 = vld [vmem:[%s612_s9] sm:$0xff]  ;;  %v701_v10 = vld [vmem:[%s612_s9 + $0x8] sm:$0xff]  ;;  %vm704_vm1 = vcmask 1040384   ;;  %vm903_vm2 = vcmask 1046528   ;;  %v1013_v39 = vshrl.u32 %v1012_v38, 7  ;;  %s4559_s2 = sld [smem:[#allocation26_spill]] }
  0xf5   : > { %v720_v12 = vpack.c.bf16 %v701_v10, %v700_v9  ;;  %v705_v14 = vrot.slane %v700_v9, 7  ;;  %v706_v15 = vrot.slane %v701_v10, 7  ;;  %v3319_v16 = vld [vmem:[#allocation5 + $0x14] ss:$8 sps:$4 sm:$0xff]   ;;  %v3317_v17 = vld [vmem:[#allocation5 + $0x10] ss:$8 sps:$4 sm:$0xff]   ;;  %vm4324_vm4 = vmneg %vm704_vm1 }
  0xf6   : > { %v3322_v18 = vld [vmem:[#allocation5 + $0x24] ss:$8 sps:$4 sm:$0xff]   ;;  %v3320_v19 = vld [vmem:[#allocation5 + $0x20] ss:$8 sps:$4 sm:$0xff]   ;;  %v3325_v20 = vld [vmem:[#allocation5 + $0x34] ss:$8 sps:$4 sm:$0xff]  }
  0xf7   : > { %777 = vmatpush1.bf16.msra.mxu0 %v3307_v4  ;;  %v3323_v21 = vld [vmem:[#allocation5 + $0x30] ss:$8 sps:$4 sm:$0xff]   ;;  %v3328_v22 = vld [vmem:[#allocation5 + $0x84] ss:$8 sps:$4 sm:$0xff]   ;;  %v707_v23 = vsel %vm704_vm1, %v705_v14, %v706_v15  ;;  %v710_v24 = vsel %vm704_vm1, 0.0, %v705_v14  ;;  %v904_v32 = vrot.slane %v700_v9, 1  ;;  %vm2967_vm5 = vmpackc.low %vm4324_vm4, %vm4324_vm4 }
  0xf8   : > { %778 = vmatprep.subr.bf16.mxu0 %v3308_v5  ;;  %v3326_v25 = vld [vmem:[#allocation5 + $0x80] ss:$8 sps:$4 sm:$0xff]   ;;  %v711_v26 = vpack.c.bf16 %v707_v23, %v710_v24  ;;  %v3331_v27 = vld [vmem:[#allocation5 + $0x94] ss:$8 sps:$4 sm:$0xff]   ;;  %v3329_v28 = vld [vmem:[#allocation5 + $0x90] ss:$8 sps:$4 sm:$0xff]  }
  0xf9   : > { %v3334_v29 = vld [vmem:[#allocation5 + $0xa4] ss:$8 sps:$4 sm:$0xff]   ;;  %v3332_v30 = vld [vmem:[#allocation5 + $0xa0] ss:$8 sps:$4 sm:$0xff]   ;;  %v3337_v31 = vld [vmem:[#allocation5 + $0xb4] ss:$8 sps:$4 sm:$0xff]  }
  0xfa   : > { %v905_v33 = vrot.slane %v701_v10, 1  ;;  %v3335_v34 = vld [vmem:[#allocation5 + $0xb0] ss:$8 sps:$4 sm:$0xff]   ;;  %v4294_v40 = vsub.s32 0, %v1013_v39  ;;  %v1010_v41 = vld [vmem:[%s4559_s2] sm:$0x3]  ;;  %vm2986_vm6 = vmpackc.low %vm903_vm2, %vm903_vm2 }
  0xfb   : > { %779 = vmatpush1.bf16.msra.mxu0 %v3310_v6  ;;  %v4299_v42 = vsub.s32 1, %v1013_v39  ;;  %s4560_s3 = sld [smem:[#allocation27_spill]]  ;;  %v3338_v3 = vld [vmem:[#allocation7 + $0x40] sm:$0xff]   ;;  %s4561_s4 = sld [smem:[#allocation28_spill]]  ;;  %vm1049_vm3 = vcmask 130048   ;;  %v3340_v6 = vld [vmem:[#allocation7 + $0x48] sm:$0xff]  }
  0xfc   : > { %780 = vmatprep.subr.bf16.mxu0 %v3311_v7  ;;  %v906_v35 = vsel %vm903_vm2, %v904_v32, %v905_v33  ;;  %v909_v36 = vsel %vm903_vm2, %v905_v33, 0.0  ;;  %v1015_v44 = vrot.slane %v1010_v41, %v4294_v40  ;;  %v3339_v5 = vld [vmem:[#allocation7] sm:$0xff]   ;;  %v3341_v7 = vld [vmem:[#allocation7 + $0x8] sm:$0xff]   ;;  %v3343_v9 = vld [vmem:[#allocation7 + $0x10] sm:$0xff]   ;;  %s2886_s12 = sshll.u32 %s4263_s14, 3  ;;  %s4564_s0 = sld [smem:[#allocation31_spill]] }
  0xfd   : > { %v910_v37 = vpack.c.bf16 %v909_v36, %v906_v35  ;;  %v1019_v45 = vrot.slane %v1010_v41, %v4299_v42  ;;  %v3344_v10 = vld [vmem:[#allocation7 + $0x58] sm:$0xff]   ;;  %v3348_v14 = vld [vmem:[#allocation7 + $0x68] sm:$0xff]   ;;  %s4317_s16 = scalar_lea.vmem [#allocation14], %s2886_s12  ;;  %vm1727_vm7 = vcmask 1043456   ;;  %s4565_s17 = sld [smem:[#allocation32_spill]]  ;;  %vm1723_vm8 = vcmask 64512  }
  0xfe   : > { %v3349_v15 = vld [vmem:[#allocation7 + $0x28] sm:$0xff]   ;;  %v3365_v32 = vld [vmem:[#allocation8 + $0xb4] ss:$8 sps:$4 sm:$0xff]   ;;  %v3363_v33 = vld [vmem:[#allocation8 + $0xb0] ss:$8 sps:$4 sm:$0xff]   ;;  %s2887_s18 = sshll.u32 %s4263_s14, 2 }
  0xff   : > { %781 = vmatpush1.bf16.msra.mxu0 %v3313_v8  ;;  %v3342_v8 = vld [vmem:[#allocation7 + $0x50] sm:$0xff]   ;;  %v3366_v35 = vld [vmem:[#allocation8 + $0xc0] ss:$8 sps:$4 sm:$0xff]   ;;  %v3374_v38 = vld [vmem:[#allocation8 + $0xe4] ss:$8 sps:$4 sm:$0xff]   ;;  %s4361_s25 = scalar_lea.vmem [#allocation15], %s2887_s18 }
 0x100   : > { %860 = vmatprep.subr.bf16.mxu0 %v3316_v11  ;;  %v3345_v11 = vld [vmem:[#allocation7 + $0x18] sm:$0xff]   ;;  %v3372_v39 = vld [vmem:[#allocation8 + $0xe0] ss:$8 sps:$4 sm:$0xff]   ;;  %vm2229_vm9 = vcmask 1042432   ;;  %s4566_s24 = sld [smem:[#allocation33_spill]]  ;;  %vm2409_vm11 = vcmask 1041408  }
 0x101   : > { %v1026_v43 = vld [vmem:[%s4560_s3] sm:$0x3]  ;;  %v3371_v36 = vld [vmem:[#allocation8 + $0xd4] ss:$8 sps:$4 sm:$0xff]   ;;  %vm3060_vm10 = vmpackc.low %vm2229_vm9, %vm2229_vm9  ;;  %vm2405_vm12 = vcmask 31744   ;;  %s2633_s18 = sand.u32 1, %s3999_s1  }
 0x102   : > { %2897 = vmatmul.mubr.msk.bf16.vlgmr.msra.gmra.mrb[0].mxu0 %vm770_vm0, %v720_v12  ;;  %v1031_v46 = vrot.slane %v1026_v43, %v4294_v40  ;;  %v1035_v48 = vrot.slane %v1026_v43, %v4299_v42  ;;  %v1046_v4 = vld [vmem:[%s4561_s4] sm:$0xf]  ;;  %v3377_v41 = vld [vmem:[#allocation8 + $0xf4] ss:$8 sps:$4 sm:$0xff]   ;;  %v3375_v43 = vld [vmem:[#allocation8 + $0xf0] ss:$8 sps:$4 sm:$0xff]  }
 0x103   : > { %861 = vmatpush1.bf16.msra.mxu0 %v3314_v13  ;;  %892 = vmatprep.mubr.bf16.mxu0 %v3879_v0  ;;  %v3346_v12 = vld [vmem:[#allocation7 + $0x60] sm:$0xff]   ;;  %s3085_s12 = sshll.u32 %s3999_s1, 6  ;;  %s4569_s9 = sld [smem:[#allocation37_spill]] }
 0x104   : > { %862 = vmatprep.subr.bf16.mxu0 %v3319_v16  ;;  %v3347_v13 = vld [vmem:[#allocation7 + $0x20] sm:$0xff]   ;;  %v3350_v16 = vld [vmem:[#allocation7 + $0x70] sm:$0xff]   ;;  %s4395_s2 = scalar_lea.sflag [#allocation16], %s2633_s18  ;;  %p4570_p9 = scmp.ne.s32.totalorder %s4546_s23, 0 }
 0x107   : > { %863 = vmatpush1.bf16.msra.mxu0 %v3317_v17  ;;  %v3351_v17 = vld [vmem:[#allocation7 + $0x30] sm:$0xff]  }
 0x108   : > { %864 = vmatprep.subr.bf16.mxu0 %v3322_v18  ;;  %v3352_v18 = vld [vmem:[#allocation7 + $0x78] sm:$0xff]  }
 0x109   : > { %s4392_s20 = scalar_lea.hbm %s4569_s9, %s3085_s12 }
 0x10b   : > { %865 = vmatpush1.bf16.msra.mxu0 %v3320_v19  ;;  %v3353_v19 = vld [vmem:[#allocation7 + $0x38] sm:$0xff]  }
 0x10c   : > { %866 = vmatprep.subr.bf16.mxu0 %v3325_v20  ;;  %v3356_v20 = vld [vmem:[#allocation8 + $0x84] ss:$8 sps:$4 sm:$0xff]  }
 0x10f   : > { %867 = vmatpush1.bf16.msra.mxu0 %v3323_v21 }
 0x110   : > { %963 = vmatprep.subr.bf16.mxu0 %v3328_v22 }
 0x112   : > { %2906 = vmatmul.mubr.msk.bf16.vlgmr.msra.gmra.mrb[0].mxu0 %vm770_vm0, %v711_v26 }
 0x113   : > { %964 = vmatpush1.bf16.msra.mxu0 %v3326_v25  ;;  %995 = vmatprep.mubr.bf16.mxu0 %v3879_v0  ;;  %v3354_v25 = vld [vmem:[#allocation8 + $0x80] ss:$8 sps:$4 sm:$0xff]  }
 0x114   : > { %965 = vmatprep.subr.bf16.mxu0 %v3331_v27 }
 0x117   : > { %966 = vmatpush1.bf16.msra.mxu0 %v3329_v28  ;;  %v3359_v28 = vld [vmem:[#allocation8 + $0x94] ss:$8 sps:$4 sm:$0xff]  }
 0x118   : > { %967 = vmatprep.subr.bf16.mxu0 %v3334_v29  ;;  %v3357_v29 = vld [vmem:[#allocation8 + $0x90] ss:$8 sps:$4 sm:$0xff]  }
 0x11b   : > { %968 = vmatpush1.bf16.msra.mxu0 %v3332_v30  ;;  %v3362_v30 = vld [vmem:[#allocation8 + $0xa4] ss:$8 sps:$4 sm:$0xff]  }
 0x11c   : > { %969 = vmatprep.subr.bf16.mxu0 %v3337_v31  ;;  %v3360_v31 = vld [vmem:[#allocation8 + $0xa0] ss:$8 sps:$4 sm:$0xff]  }
 0x11f   : > { %970 = vmatpush1.bf16.msra.mxu0 %v3335_v34  ;;  %v3368_v34 = vld [vmem:[#allocation8 + $0xc4] ss:$8 sps:$4 sm:$0xff]  }
 0x122   : > { %2915 = vmatmul.mubr.msk.bf16.vlgmr.msra.gmra.mrb[0].mxu0 %vm770_vm0, %v910_v37  ;;  %v3369_v37 = vld [vmem:[#allocation8 + $0xd0] ss:$8 sps:$4 sm:$0xff]  }
 0x1f5   : > { %v997_v47 = vpop.f32.mrb[0].mxu0 }
 0x1f6   : > { %v1022_v49 = vmul.f32 %v1015_v44, %v997_v47  ;;  %v999_v50 = vpop.f32.mrb[1].mxu0 }
 0x1f7   : > { %v1023_v51 = vmul.f32 %v1019_v45, %v999_v50  ;;  %v1001_v52 = vpop.f32.mrb[2].mxu0  ;;  %v3378_v50 = vld [vmem:[#allocation8] ss:$8 sps:$4 sm:$0xff]  }
 0x1f8   : > { %v1038_v53 = vadd.f32 %v1031_v46, %v1022_v49  ;;  %v1024_v54 = vmul.f32 %v1015_v44, %v1001_v52  ;;  %v1003_v55 = vpop.f32.mrb[3].mxu0  ;;  %v3380_v44 = vld [vmem:[#allocation8 + $0x4] ss:$8 sps:$4 sm:$0xff]   ;;  %v3383_v52 = vld [vmem:[#allocation8 + $0x14] ss:$8 sps:$4 sm:$0xff]  }
 0x1f9   : > { %v1025_v56 = vmul.f32 %v1019_v45, %v1003_v55  ;;  %v1039_v57 = vadd.f32 %v1035_v48, %v1023_v51  ;;  %v3384_v55 = vld [vmem:[#allocation8 + $0x20] ss:$8 sps:$4 sm:$0xff]  }
 0x1fa   : > { %v1040_v58 = vadd.f32 %v1031_v46, %v1024_v54  ;;  %v1042_v60 = vmax.f32 %v1038_v53, 0.0  ;;  %v3381_v53 = vld [vmem:[#allocation8 + $0x10] ss:$8 sps:$4 sm:$0xff]   ;;  %v3386_v54 = vld [vmem:[#allocation8 + $0x24] ss:$8 sps:$4 sm:$0xff]  }
 0x1fb   : > { %v1041_v59 = vadd.f32 %v1035_v48, %v1025_v56  ;;  %v1043_v62 = vmax.f32 %v1039_v57, 0.0  ;;  %v3389_v56 = vld [vmem:[#allocation8 + $0x34] ss:$8 sps:$4 sm:$0xff]   ;;  %v3387_v57 = vld [vmem:[#allocation8 + $0x30] ss:$8 sps:$4 sm:$0xff]  }
 0x1fc   : > { %v1044_v61 = vmax.f32 %v1040_v58, 0.0  ;;  %v3392_v58 = vld [vmem:[#allocation8 + $0x44] ss:$8 sps:$4 sm:$0xff]  }
 0x1fd   : > { %v1045_v63 = vmax.f32 %v1041_v59, 0.0  ;;  %v3390_v59 = vld [vmem:[#allocation8 + $0x40] ss:$8 sps:$4 sm:$0xff]  }
 0x1fe   : > { %v1047_v1 = vpack.c.bf16 %v1044_v61, %v1042_v60  ;;  %v3395_v60 = vld [vmem:[#allocation8 + $0x54] ss:$8 sps:$4 sm:$0xff]   ;;  %v3393_v61 = vld [vmem:[#allocation8 + $0x50] ss:$8 sps:$4 sm:$0xff]  }
 0x1ff   : > { %v1048_v2 = vpack.c.bf16 %v1045_v63, %v1043_v62  ;;  %v3398_v62 = vld [vmem:[#allocation8 + $0x64] ss:$8 sps:$4 sm:$0xff]   ;;  %v3396_v63 = vld [vmem:[#allocation8 + $0x60] ss:$8 sps:$4 sm:$0xff]  }
 0x201   : > { %1053 = vmatprep.subr.bf16.mxu1 %v1048_v2  ;;  %v3399_v2 = vld [vmem:[#allocation8 + $0x70] ss:$8 sps:$4 sm:$0xff]  }
 0x202   : > { %1054 = vmatpush1.bf16.msra.mxu1 %v1047_v1  ;;  %v3401_v1 = vld [vmem:[#allocation8 + $0x74] ss:$8 sps:$4 sm:$0xff]  }
 0x203   : > { %3090 = vmatprep.subr.bf16.mxu1 %v3338_v3 }
 0x205   : > { %2916 = vmatmul.mubr.msk.bf16.vlgmr.msra.gmra.mrb[0].mxu1 %vm1049_vm3, %v1046_v4  ;;  %v3507_v4 = vld [vmem:[#allocation11 + $0x154] ss:$8 sps:$4 sm:$0xff]  }
 0x206   : > { %3091 = vmatpush3.bf16.msra.mxu1 %v3339_v5  ;;  %v3404_v5 = vld [vmem:[#allocation8 + $0x104] ss:$8 sps:$4 sm:$0xff]  }
 0x207   : > { %3092 = vmatprep.subr.bf16.mxu1 %v3340_v6  ;;  %v3402_v6 = vld [vmem:[#allocation8 + $0x100] ss:$8 sps:$4 sm:$0xff]  }
 0x20a   : > { %3093 = vmatpush3.bf16.msra.mxu1 %v3341_v7 }
 0x20b   : > { %3094 = vmatprep.subr.bf16.mxu1 %v3342_v8  ;;  %v3407_v8 = vld [vmem:[#allocation8 + $0x114] ss:$8 sps:$4 sm:$0xff]  }
 0x20e   : > { %3095 = vmatpush3.bf16.msra.mxu1 %v3343_v9  ;;  %v3405_v9 = vld [vmem:[#allocation8 + $0x110] ss:$8 sps:$4 sm:$0xff]  }
 0x20f   : > { %3096 = vmatprep.subr.bf16.mxu1 %v3344_v10  ;;  %v3410_v10 = vld [vmem:[#allocation8 + $0x124] ss:$8 sps:$4 sm:$0xff]  }
 0x212   : > { %3097 = vmatpush3.bf16.msra.mxu1 %v3345_v11  ;;  %v3408_v11 = vld [vmem:[#allocation8 + $0x120] ss:$8 sps:$4 sm:$0xff]  }
 0x213   : > { %3098 = vmatprep.subr.bf16.mxu1 %v3346_v12  ;;  %v3413_v12 = vld [vmem:[#allocation8 + $0x134] ss:$8 sps:$4 sm:$0xff]  }
 0x216   : > { %3099 = vmatpush3.bf16.msra.mxu1 %v3347_v13  ;;  %v3411_v13 = vld [vmem:[#allocation8 + $0x130] ss:$8 sps:$4 sm:$0xff]  }
 0x217   : > { %3100 = vmatprep.subr.bf16.mxu1 %v3348_v14  ;;  %v3416_v14 = vld [vmem:[#allocation8 + $0x144] ss:$8 sps:$4 sm:$0xff]  }
 0x21a   : > { %3101 = vmatpush3.bf16.msra.mxu1 %v3349_v15  ;;  %v3414_v15 = vld [vmem:[#allocation8 + $0x140] ss:$8 sps:$4 sm:$0xff]  }
 0x21b   : > { %3102 = vmatprep.subr.bf16.mxu1 %v3350_v16  ;;  %v3419_v16 = vld [vmem:[#allocation8 + $0x154] ss:$8 sps:$4 sm:$0xff]  }
 0x21e   : > { %3103 = vmatpush3.bf16.msra.mxu1 %v3351_v17  ;;  %v3417_v17 = vld [vmem:[#allocation8 + $0x150] ss:$8 sps:$4 sm:$0xff]  }
 0x21f   : > { %3104 = vmatprep.subr.bf16.mxu1 %v3352_v18  ;;  %v3422_v18 = vld [vmem:[#allocation8 + $0x164] ss:$8 sps:$4 sm:$0xff]  }
 0x222   : > { %3105 = vmatpush3.bf16.msra.mxu1 %v3353_v19  ;;  %v3420_v19 = vld [vmem:[#allocation8 + $0x160] ss:$8 sps:$4 sm:$0xff]  }
 0x223   : > { %1384 = vmatprep.subr.bf16.mxu1 %v3356_v20  ;;  %v3425_v20 = vld [vmem:[#allocation8 + $0x174] ss:$8 sps:$4 sm:$0xff]  }
 0x2d8   : > { %v1087_v21 = vpop.f32.mrb[0].mxu1 }
 0x2d9   : > { %v1089_v22 = vpop.f32.mrb[1].mxu1  ;;  %v1094_v26 = vpack.c.bf16 %v1087_v21, %v1087_v21  ;;  %v3423_v21 = vld [vmem:[#allocation8 + $0x170] ss:$8 sps:$4 sm:$0xff]  }
 0x2da   : > { %v1095_v23 = vpack.c.bf16 %v1089_v22, %v1089_v22  ;;  %v1091_v24 = vpop.f32.mrb[2].mxu1 }
 0x2db   : > { %v1092_v27 = vpop.f32.mrb[3].mxu1  ;;  %v3426_v24 = vld [vmem:[#allocation10 + $0x40] sm:$0xff]  }
 0x2dc   : > { %1256 = vmatprep.mubr.bf16.mxu1 %v1095_v23  ;;  %3112 = vmatprep.subr.bf16.mxu0 %v3426_v24  ;;  %v3429_v27 = vld [vmem:[#allocation10 + $0x8] sm:$0xff]  }
 0x2dd   : > { %1257 = vmatmul.mubr.bf16.vlgmr.msra.gmra.mrb[4].mxu1 %v1094_v26  ;;  %v3428_v26 = vld [vmem:[#allocation10 + $0x48] sm:$0xff]  }
 0x2de   : > { %1385 = vmatpush1.bf16.msra.mxu1 %v3354_v25  ;;  %1416 = vmatprep.mubr.bf16.mxu1 %v3879_v0  ;;  %v3427_v25 = vld [vmem:[#allocation10] sm:$0xff]  }
 0x2df   : > { %1386 = vmatprep.subr.bf16.mxu1 %v3359_v28  ;;  %3113 = vmatpush3.bf16.msra.mxu0 %v3427_v25  ;;  %v3430_v28 = vld [vmem:[#allocation10 + $0x50] sm:$0xff]  }
 0x2e0   : > { %3114 = vmatprep.subr.bf16.mxu0 %v3428_v26 }
 0x2e2   : > { %1387 = vmatpush1.bf16.msra.mxu1 %v3357_v29  ;;  %v3431_v29 = vld [vmem:[#allocation10 + $0x10] sm:$0xff]  }
 0x2e3   : > { %1388 = vmatprep.subr.bf16.mxu1 %v3362_v30  ;;  %3115 = vmatpush3.bf16.msra.mxu0 %v3429_v27  ;;  %v3432_v30 = vld [vmem:[#allocation10 + $0x58] sm:$0xff]  }
 0x2e4   : > { %3116 = vmatprep.subr.bf16.mxu0 %v3430_v28  ;;  %v3466_v28 = vld [vmem:[#allocation11] ss:$8 sps:$4 sm:$0xff]  }
 0x2e6   : > { %1389 = vmatpush1.bf16.msra.mxu1 %v3360_v31  ;;  %v3433_v31 = vld [vmem:[#allocation10 + $0x18] sm:$0xff]  }
 0x2e7   : > { %1390 = vmatprep.subr.bf16.mxu1 %v3365_v32  ;;  %3117 = vmatpush3.bf16.msra.mxu0 %v3431_v29  ;;  %v3434_v32 = vld [vmem:[#allocation10 + $0x60] sm:$0xff]  }
 0x2e8   : > { %3118 = vmatprep.subr.bf16.mxu0 %v3432_v30  ;;  %v3471_v30 = vld [vmem:[#allocation11 + $0x14] ss:$8 sps:$4 sm:$0xff]  }
 0x2ea   : > { %1391 = vmatpush1.bf16.msra.mxu1 %v3363_v33  ;;  %v3435_v33 = vld [vmem:[#allocation10 + $0x20] sm:$0xff]  }
 0x2eb   : > { %1392 = vmatprep.subr.bf16.mxu1 %v3368_v34  ;;  %3119 = vmatpush3.bf16.msra.mxu0 %v3433_v31  ;;  %v3436_v34 = vld [vmem:[#allocation10 + $0x68] sm:$0xff]   ;;  %v3469_v31 = vld [vmem:[#allocation11 + $0x10] ss:$8 sps:$4 sm:$0xff]  }
 0x2ec   : > { %3120 = vmatprep.subr.bf16.mxu0 %v3434_v32  ;;  %v3474_v32 = vld [vmem:[#allocation11 + $0x24] ss:$8 sps:$4 sm:$0xff]  }
 0x2ee   : > { %1393 = vmatpush1.bf16.msra.mxu1 %v3366_v35  ;;  %v3437_v35 = vld [vmem:[#allocation10 + $0x28] sm:$0xff]  }
 0x2ef   : > { %1394 = vmatprep.subr.bf16.mxu1 %v3371_v36  ;;  %3121 = vmatpush3.bf16.msra.mxu0 %v3435_v33  ;;  %v3438_v36 = vld [vmem:[#allocation10 + $0x70] sm:$0xff]   ;;  %v3472_v33 = vld [vmem:[#allocation11 + $0x20] ss:$8 sps:$4 sm:$0xff]  }
 0x2f0   : > { %3122 = vmatprep.subr.bf16.mxu0 %v3436_v34  ;;  %v3477_v34 = vld [vmem:[#allocation11 + $0x34] ss:$8 sps:$4 sm:$0xff]  }
 0x2f2   : > { %1395 = vmatpush1.bf16.msra.mxu1 %v3369_v37  ;;  %v3439_v37 = vld [vmem:[#allocation10 + $0x30] sm:$0xff]  }
 0x2f3   : > { %1396 = vmatprep.subr.bf16.mxu1 %v3374_v38  ;;  %3123 = vmatpush3.bf16.msra.mxu0 %v3437_v35  ;;  %v1690_v38 = vld [vmem:[%s4498_s7] sm:$0x3]  ;;  %v3475_v35 = vld [vmem:[#allocation11 + $0x30] ss:$8 sps:$4 sm:$0xff]  }
 0x2f4   : > { %3124 = vmatprep.subr.bf16.mxu0 %v3438_v36  ;;  %v3480_v36 = vld [vmem:[#allocation11 + $0x44] ss:$8 sps:$4 sm:$0xff]  }
 0x2f6   : > { %1397 = vmatpush1.bf16.msra.mxu1 %v3372_v39  ;;  %v1704_v39 = vld [vmem:[%s4564_s0] sm:$0x3]  ;;  %s4567_s0 = sld [smem:[#allocation34_spill]] }
 0x2f7   : > { %1398 = vmatprep.subr.bf16.mxu1 %v3377_v41  ;;  %3125 = vmatpush3.bf16.msra.mxu0 %v3439_v37  ;;  %v1695_v41 = vrot.slane %v1690_v38, %v4294_v40  ;;  %v3478_v37 = vld [vmem:[#allocation11 + $0x40] ss:$8 sps:$4 sm:$0xff]  }
 0x2fa   : > { %1399 = vmatpush1.bf16.msra.mxu1 %v3375_v43  ;;  %v1699_v43 = vrot.slane %v1690_v38, %v4299_v42  ;;  %v3483_v38 = vld [vmem:[#allocation11 + $0x54] ss:$8 sps:$4 sm:$0xff]  }
 0x2fb   : > { %1505 = vmatprep.subr.bf16.mxu1 %v3380_v44  ;;  %v1709_v44 = vrot.slane %v1704_v39, %v4294_v40 }
 0x3b0   : > { %v3106_v45 = vpop.f32.mrb[4].mxu1 }
 0x3b1   : > { %v3107_v46 = vpop.f32.mrb[5].mxu1 }
 0x3b2   : > { %v4313_v47 = vadd.f32 %v3107_v46, %v3106_v45  ;;  %v3109_v48 = vpop.f32.mrb[6].mxu1  ;;  %v1713_v46 = vrot.slane %v1704_v39, %v4299_v42  ;;  %v3481_v39 = vld [vmem:[#allocation11 + $0x50] ss:$8 sps:$4 sm:$0xff]  }
 0x3b3   : > { %v3110_v49 = vpop.f32.mrb[7].mxu1 }
 0x3b4   : > { %v1286_v51 = vpack.c.bf16 %v4313_v47, %v4313_v47  ;;  %1264 = vst [vmem:[%s4317_s16] sm:$0xff] %v4313_v47  ;;  %v1266_v3 = vrot.slane %v4313_v47, 7  ;;  %v1546_v22 = vrot.slane %v4313_v47, 1 }
 0x3b6   : > { %1417 = vmatmul.mubr.bf16.vlgmr.msra.gmra.mrb[8].mxu1 %v1286_v51  ;;  %v2968_v7 = vpack.c.bf16 %v1266_v3, %v1266_v3  ;;  %v2987_v23 = vpack.c.bf16 %v1546_v22, %v1546_v22  ;;  %v3468_v22 = vld [vmem:[#allocation11 + $0x4] ss:$8 sps:$4 sm:$0xff]  }
 0x3b7   : > { %1506 = vmatpush1.bf16.msra.mxu1 %v3378_v50  ;;  %1537 = vmatprep.mubr.bf16.mxu1 %v3879_v0 }
 0x3b8   : > { %1507 = vmatprep.subr.bf16.mxu1 %v3383_v52 }
 0x3bb   : > { %1508 = vmatpush1.bf16.msra.mxu1 %v3381_v53 }
 0x3bc   : > { %1509 = vmatprep.subr.bf16.mxu1 %v3386_v54 }
 0x3bf   : > { %1510 = vmatpush1.bf16.msra.mxu1 %v3384_v55 }
 0x3c0   : > { %1511 = vmatprep.subr.bf16.mxu1 %v3389_v56 }
 0x3c3   : > { %1512 = vmatpush1.bf16.msra.mxu1 %v3387_v57 }
 0x3c4   : > { %1513 = vmatprep.subr.bf16.mxu1 %v3392_v58 }
 0x3c7   : > { %1514 = vmatpush1.bf16.msra.mxu1 %v3390_v59  ;;  %v1720_v59 = vld [vmem:[%s4565_s17] sm:$0x3]  ;;  %s4568_s17 = sld [smem:[#allocation35_spill]] }
 0x3c8   : > { %1515 = vmatprep.subr.bf16.mxu1 %v3395_v60  ;;  %v3440_v60 = vld [vmem:[#allocation10 + $0x78] sm:$0xff]  }
 0x3c9   : > { %3126 = vmatprep.subr.bf16.mxu0 %v3440_v60  ;;  %v3513_v60 = vld [vmem:[#allocation11 + $0x174] ss:$8 sps:$4 sm:$0xff]  }
 0x3cb   : > { %1516 = vmatpush1.bf16.msra.mxu1 %v3393_v61  ;;  %v3441_v61 = vld [vmem:[#allocation10 + $0x38] sm:$0xff]  }
 0x3cc   : > { %1517 = vmatprep.subr.bf16.mxu1 %v3398_v62  ;;  %3127 = vmatpush3.bf16.msra.mxu0 %v3441_v61  ;;  %v3444_v62 = vld [vmem:[#allocation11 + $0x84] ss:$8 sps:$4 sm:$0xff]   ;;  %v3511_v61 = vld [vmem:[#allocation11 + $0x170] ss:$8 sps:$4 sm:$0xff]  }
 0x3cd   : > { %2065 = vmatprep.subr.bf16.mxu0 %v3444_v62 }
 0x3cf   : > { %1518 = vmatpush1.bf16.msra.mxu1 %v3396_v63 }
 0x3d0   : > { %1519 = vmatprep.subr.bf16.mxu1 %v3401_v1 }
 0x3d3   : > { %1520 = vmatpush1.bf16.msra.mxu1 %v3399_v2 }
 0x3d4   : > { %1647 = vmatprep.subr.bf16.mxu1 %v3404_v5  ;;  %v3442_v5 = vld [vmem:[#allocation11 + $0x80] ss:$8 sps:$4 sm:$0xff]  }
 0x3d6   : > { %2969 = vmatmul.mubr.msk.bf16.vlgmr.msra.gmra.mrb[8].mxu1 %vm2967_vm5, %v2968_v7 }
 0x3d7   : > { %1648 = vmatpush1.bf16.msra.mxu1 %v3402_v6  ;;  %1679 = vmatprep.mubr.bf16.mxu1 %v3879_v0 }
 0x3d8   : > { %1649 = vmatprep.subr.bf16.mxu1 %v3407_v8  ;;  %v3447_v8 = vld [vmem:[#allocation11 + $0x94] ss:$8 sps:$4 sm:$0xff]  }
 0x3db   : > { %1650 = vmatpush1.bf16.msra.mxu1 %v3405_v9  ;;  %v3445_v9 = vld [vmem:[#allocation11 + $0x90] ss:$8 sps:$4 sm:$0xff]  }
 0x3dc   : > { %1651 = vmatprep.subr.bf16.mxu1 %v3410_v10  ;;  %v3450_v10 = vld [vmem:[#allocation11 + $0xa4] ss:$8 sps:$4 sm:$0xff]  }
 0x3df   : > { %1652 = vmatpush1.bf16.msra.mxu1 %v3408_v11  ;;  %v3448_v11 = vld [vmem:[#allocation11 + $0xa0] ss:$8 sps:$4 sm:$0xff]  }
 0x3e0   : > { %1653 = vmatprep.subr.bf16.mxu1 %v3413_v12  ;;  %v3453_v12 = vld [vmem:[#allocation11 + $0xb4] ss:$8 sps:$4 sm:$0xff]  }
 0x3e3   : > { %1654 = vmatpush1.bf16.msra.mxu1 %v3411_v13  ;;  %v3451_v13 = vld [vmem:[#allocation11 + $0xb0] ss:$8 sps:$4 sm:$0xff]  }
 0x3e4   : > { %1655 = vmatprep.subr.bf16.mxu1 %v3416_v14  ;;  %v3456_v14 = vld [vmem:[#allocation11 + $0xc4] ss:$8 sps:$4 sm:$0xff]  }
 0x3e7   : > { %1656 = vmatpush1.bf16.msra.mxu1 %v3414_v15  ;;  %v3454_v15 = vld [vmem:[#allocation11 + $0xc0] ss:$8 sps:$4 sm:$0xff]  }
 0x3e8   : > { %1657 = vmatprep.subr.bf16.mxu1 %v3419_v16  ;;  %v3459_v16 = vld [vmem:[#allocation11 + $0xd4] ss:$8 sps:$4 sm:$0xff]  }
 0x3eb   : > { %1658 = vmatpush1.bf16.msra.mxu1 %v3417_v17  ;;  %v3457_v17 = vld [vmem:[#allocation11 + $0xd0] ss:$8 sps:$4 sm:$0xff]  }
 0x3ec   : > { %1659 = vmatprep.subr.bf16.mxu1 %v3422_v18  ;;  %v3462_v18 = vld [vmem:[#allocation11 + $0xe4] ss:$8 sps:$4 sm:$0xff]  }
 0x3ef   : > { %1660 = vmatpush1.bf16.msra.mxu1 %v3420_v19  ;;  %v3460_v19 = vld [vmem:[#allocation11 + $0xe0] ss:$8 sps:$4 sm:$0xff]  }
 0x3f0   : > { %1661 = vmatprep.subr.bf16.mxu1 %v3425_v20  ;;  %v3465_v20 = vld [vmem:[#allocation11 + $0xf4] ss:$8 sps:$4 sm:$0xff]  }
 0x3f3   : > { %1662 = vmatpush1.bf16.msra.mxu1 %v3423_v21  ;;  %v3463_v21 = vld [vmem:[#allocation11 + $0xf0] ss:$8 sps:$4 sm:$0xff]  }
 0x3f6   : > { %2988 = vmatmul.mubr.msk.bf16.vlgmr.msra.gmra.mrb[8].mxu1 %vm2986_vm6, %v2987_v23 }
 0x3f7   : > { %1766 = vmatprep.mubr.bf16.mxu1 %v3879_v0 }
 0x4c9   : > { %v1681_v45 = vpop.f32.mrb[8].mxu1 }
 0x4ca   : > { %v1702_v47 = vmul.f32 %v1695_v41, %v1681_v45  ;;  %v1683_v48 = vpop.f32.mrb[9].mxu1  ;;  %v3486_v41 = vld [vmem:[#allocation11 + $0x64] ss:$8 sps:$4 sm:$0xff]   ;;  %v3487_v45 = vld [vmem:[#allocation11 + $0x70] ss:$8 sps:$4 sm:$0xff]  }
 0x4cb   : > { %v1703_v49 = vmul.f32 %v1699_v43, %v1683_v48  ;;  %v1685_v50 = vpop.f32.mrb[10].mxu1  ;;  %v3484_v43 = vld [vmem:[#allocation11 + $0x60] ss:$8 sps:$4 sm:$0xff]  }
 0x4cc   : > { %v1716_v51 = vadd.f32 %v1709_v44, %v1702_v47  ;;  %v1686_v52 = vpop.f32.mrb[11].mxu1  ;;  %v3489_v44 = vld [vmem:[#allocation11 + $0x74] ss:$8 sps:$4 sm:$0xff]   ;;  %v3492_v47 = vld [vmem:[#allocation11 + $0x104] ss:$8 sps:$4 sm:$0xff]  }
 0x4cd   : > { %v1717_v53 = vadd.f32 %v1713_v46, %v1703_v49  ;;  %v3490_v48 = vld [vmem:[#allocation11 + $0x100] ss:$8 sps:$4 sm:$0xff]   ;;  %v3495_v50 = vld [vmem:[#allocation11 + $0x114] ss:$8 sps:$4 sm:$0xff]   ;;  %v3498_v52 = vld [vmem:[#allocation11 + $0x124] ss:$8 sps:$4 sm:$0xff]  }
 0x4ce   : > { %v1718_v54 = vmax.f32 %v1716_v51, 0.0  ;;  %v3493_v51 = vld [vmem:[#allocation11 + $0x110] ss:$8 sps:$4 sm:$0xff]  }
 0x4cf   : > { %v1719_v55 = vmax.f32 %v1717_v53, 0.0  ;;  %v3496_v53 = vld [vmem:[#allocation11 + $0x120] ss:$8 sps:$4 sm:$0xff]  }
 0x4d0   : > { %v1721_v56 = vpack.c.bf16 %v1718_v54, %v1718_v54  ;;  %v3501_v54 = vld [vmem:[#allocation11 + $0x134] ss:$8 sps:$4 sm:$0xff]  }
 0x4d1   : > { %v1722_v57 = vpack.c.bf16 %v1719_v55, %v1719_v55  ;;  %v3499_v55 = vld [vmem:[#allocation11 + $0x130] ss:$8 sps:$4 sm:$0xff]  }
 0x4d2   : > { %v1729_v58 = vsel %vm1727_vm7, %v1721_v56, 0  ;;  %v3504_v56 = vld [vmem:[#allocation11 + $0x144] ss:$8 sps:$4 sm:$0xff]  }
 0x4d3   : > { %2989 = vmatprep.subr.msk.bf16.mxu1 %vm1727_vm7, %v1722_v57  ;;  %v3502_v57 = vld [vmem:[#allocation11 + $0x140] ss:$8 sps:$4 sm:$0xff]  }
 0x4d4   : > { %1735 = vmatpush1.bf16.msra.mxu1 %v1729_v58  ;;  %v3505_v58 = vld [vmem:[#allocation11 + $0x150] ss:$8 sps:$4 sm:$0xff]  }
 0x4d7   : > { %2990 = vmatmul.mubr.msk.bf16.vlgmr.msra.gmra.mrb[12].mxu1 %vm1723_vm8, %v1720_v59  ;;  %v3510_v59 = vld [vmem:[#allocation11 + $0x164] ss:$8 sps:$4 sm:$0xff]  }
 0x4d8   : > { %2448 = vmatprep.mubr.bf16.mxu1 %v3879_v0 }
 0x5aa   : > { %v1768_v63 = vpop.f32.mrb[12].mxu1 }
 0x5ab   : > { %v1770_v1 = vpop.f32.mrb[13].mxu1  ;;  %v1775_v6 = vpack.c.bf16 %v1768_v63, %v1768_v63 }
 0x5ac   : > { %v1776_v2 = vpack.c.bf16 %v1770_v1, %v1770_v1  ;;  %v1772_v3 = vpop.f32.mrb[14].mxu1  ;;  %v2372_v1 = vld [vmem:[%s4566_s24] sm:$0x3] }
 0x5ad   : > { %v1773_v7 = vpop.f32.mrb[15].mxu1  ;;  %v2377_v3 = vrot.slane %v2372_v1, %v4294_v40 }
 0x5ae   : > { %1937 = vmatprep.mubr.bf16.mxu0 %v1776_v2  ;;  %v2386_v2 = vld [vmem:[%s4567_s0] sm:$0x3]  ;;  %s2665_s0 = sshll.u32 %s4361_s25, 4  ;;  %s2666_s0 = int_to_ptr.vmem [resolvable:$true] %s2665_s0 }
 0x5af   : > { %1938 = vmatmul.mubr.bf16.vlgmr.msra.gmra.mrb[4].mxu0 %v1775_v6  ;;  %v2391_v6 = vrot.slane %v2386_v2, %v4294_v40  ;;  %v2402_v40 = vld [vmem:[%s4568_s17] sm:$0x1]  ;;  %s3728_s19 = scalar_lea.vmem %s2666_s0, 64  ;;  %s3880_s17 = smov [#allocation15]  }
 0x5b0   : > { %2066 = vmatpush1.bf16.msra.mxu0 %v3442_v5  ;;  %2097 = vmatprep.mubr.bf16.mxu0 %v3879_v0  ;;  %v2381_v5 = vrot.slane %v2372_v1, %v4299_v42  ;;  %p3729_p6 = scmp.ne.s32.totalorder %s2666_s0, %s3728_s19  ;;  %s3732_s3 = sshll.u32 %s3880_s17, 4  ;;  %s3733_s3 = int_to_ptr.vmem [resolvable:$false] %s3732_s3 }
 0x5b1   : > { %2067 = vmatprep.subr.bf16.mxu0 %v3447_v8  ;;  %v2395_v8 = vrot.slane %v2386_v2, %v4299_v42  ;;  %v3515_v42 = vld [vmem:[#allocation13] sm:$0xff]   ;;  %s3734_s4 = scalar_lea.vmem %s3733_s3, 128  ;;  %p3735_p13 = scmp.lt.s32.totalorder %s2666_s0, %s3733_s3 }
 0x5b2   : > { %p3730_p12 = pnand %p3729_p6, %p4570_p9  ;;  %p3736_p0 = scmp.lt.s32.totalorder %s3734_s4, %s3728_s19 }
 0x5b4   : > { %2068 = vmatpush1.bf16.msra.mxu0 %v3445_v9  ;;  %p3731_p1 = pneg %p3730_p12  ;;  %p3737_p2 = por %p3736_p0, %p3735_p13 }
 0x5b5   : > { %2069 = vmatprep.subr.bf16.mxu0 %v3450_v10 }
 0x5b6   : > { %p3738_p8 = pnand %p3737_p2, %p3731_p1 }
 0x5b8   : > { %2070 = vmatpush1.bf16.msra.mxu0 %v3448_v11 }
 0x5b9   : > { %2071 = vmatprep.subr.bf16.mxu0 %v3453_v12 }
 0x5bc   : > { %2072 = vmatpush1.bf16.msra.mxu0 %v3451_v13 }
 0x5bd   : > { %2073 = vmatprep.subr.bf16.mxu0 %v3456_v14 }
 0x5c0   : > { %2074 = vmatpush1.bf16.msra.mxu0 %v3454_v15 }
 0x5c1   : > { %2075 = vmatprep.subr.bf16.mxu0 %v3459_v16 }
 0x5c4   : > { %2076 = vmatpush1.bf16.msra.mxu0 %v3457_v17 }
 0x5c5   : > { %2077 = vmatprep.subr.bf16.mxu0 %v3462_v18 }
 0x5c8   : > { %2078 = vmatpush1.bf16.msra.mxu0 %v3460_v19 }
 0x5c9   : > { %2079 = vmatprep.subr.bf16.mxu0 %v3465_v20  ;;  %v3514_v20 = vld [vmem:[#allocation13 + $0x40] sm:$0xff]  }
 0x5cc   : > { %2080 = vmatpush1.bf16.msra.mxu0 %v3463_v21 }
 0x5cd   : > { %2186 = vmatprep.subr.bf16.mxu0 %v3468_v22  ;;  %v3516_v22 = vld [vmem:[#allocation13 + $0x48] sm:$0xff]  }
 0x682   : > { %v3128_v23 = vpop.f32.mrb[4].mxu0 }
 0x683   : > { %v3129_v24 = vpop.f32.mrb[5].mxu0 }
 0x684   : > { %v4357_v25 = vadd.f32 %v3129_v24, %v3128_v23  ;;  %v3131_v26 = vpop.f32.mrb[6].mxu0  ;;  %v3517_v23 = vld [vmem:[#allocation13 + $0x8] sm:$0xff]   ;;  %v3518_v24 = vld [vmem:[#allocation13 + $0x50] sm:$0xff]  }
 0x685   : > { %v3132_v27 = vpop.f32.mrb[7].mxu0  ;;  %v3520_v26 = vld [vmem:[#allocation13 + $0x58] sm:$0xff]  }
 0x686   : > { %v1967_v29 = vpack.c.bf16 %v4357_v25, %v4357_v25  ;;  %1945 = vst [vmem:[%s4361_s25] sm:$0xf] %v4357_v25  ;;  %v1947_v46 = vrot.slane %v4357_v25, 7  ;;  %v2227_v62 = vrot.slane %v4357_v25, 1  ;;  %v3519_v25 = vld [vmem:[#allocation13 + $0x10] sm:$0xff]   ;;  %v3521_v27 = vld [vmem:[#allocation13 + $0x18] sm:$0xff]  }
 0x688   : > { %2098 = vmatmul.mubr.bf16.vlgmr.msra.gmra.mrb[8].mxu0 %v1967_v29  ;;  %v3042_v49 = vpack.c.bf16 %v1947_v46, %v1947_v46  ;;  %v3061_v63 = vpack.c.bf16 %v2227_v62, %v2227_v62  ;;  %v3523_v29 = vld [vmem:[#allocation13 + $0x20] sm:$0xff]  }
 0x689   : > { %2187 = vmatpush1.bf16.msra.mxu0 %v3466_v28  ;;  %2218 = vmatprep.mubr.bf16.mxu0 %v3879_v0  ;;  %v3522_v28 = vld [vmem:[#allocation13 + $0x60] sm:$0xff]  }
 0x68a   : > { %2188 = vmatprep.subr.bf16.mxu0 %v3471_v30  ;;  %v3524_v30 = vld [vmem:[#allocation13 + $0x68] sm:$0xff]  }
 0x68d   : > { %2189 = vmatpush1.bf16.msra.mxu0 %v3469_v31  ;;  %v3525_v31 = vld [vmem:[#allocation13 + $0x28] sm:$0xff]  }
 0x68e   : > { %2190 = vmatprep.subr.bf16.mxu0 %v3474_v32  ;;  %v3526_v32 = vld [vmem:[#allocation13 + $0x70] sm:$0xff]  }
 0x691   : > { %2191 = vmatpush1.bf16.msra.mxu0 %v3472_v33  ;;  %v3527_v33 = vld [vmem:[#allocation13 + $0x30] sm:$0xff]  }
 0x692   : > { %2192 = vmatprep.subr.bf16.mxu0 %v3477_v34  ;;  %v3528_v34 = vld [vmem:[#allocation13 + $0x78] sm:$0xff]  }
 0x695   : > { %2193 = vmatpush1.bf16.msra.mxu0 %v3475_v35  ;;  %v3529_v35 = vld [vmem:[#allocation13 + $0x38] sm:$0xff]  }
 0x696   : > { %2194 = vmatprep.subr.bf16.mxu0 %v3480_v36 }
 0x699   : > { %2195 = vmatpush1.bf16.msra.mxu0 %v3478_v37 }
 0x69a   : > { %2196 = vmatprep.subr.bf16.mxu0 %v3483_v38 }
 0x69d   : > { %2197 = vmatpush1.bf16.msra.mxu0 %v3481_v39 }
 0x69e   : > { %2198 = vmatprep.subr.bf16.mxu0 %v3486_v41 }
 0x6a1   : > { %2199 = vmatpush1.bf16.msra.mxu0 %v3484_v43 }
 0x6a2   : > { %2200 = vmatprep.subr.bf16.mxu0 %v3489_v44 }
 0x6a5   : > { %2201 = vmatpush1.bf16.msra.mxu0 %v3487_v45 }
 0x6a6   : > { %2329 = vmatprep.subr.bf16.mxu0 %v3492_v47 }
 0x6a8   : > { %3043 = vmatmul.mubr.msk.bf16.vlgmr.msra.gmra.mrb[8].mxu0 %vm2967_vm5, %v3042_v49 }
 0x6a9   : > { %2330 = vmatpush1.bf16.msra.mxu0 %v3490_v48  ;;  %2361 = vmatprep.mubr.bf16.mxu0 %v3879_v0  ;;  %v3508_v0 = vld [vmem:[#allocation11 + $0x160] ss:$8 sps:$4 sm:$0xff]  }
 0x6aa   : > { %2331 = vmatprep.subr.bf16.mxu0 %v3495_v50 }
 0x6ad   : > { %2332 = vmatpush1.bf16.msra.mxu0 %v3493_v51 }
 0x6ae   : > { %2333 = vmatprep.subr.bf16.mxu0 %v3498_v52 }
 0x6b1   : > { %2334 = vmatpush1.bf16.msra.mxu0 %v3496_v53 }
 0x6b2   : > { %2335 = vmatprep.subr.bf16.mxu0 %v3501_v54 }
 0x6b5   : > { %2336 = vmatpush1.bf16.msra.mxu0 %v3499_v55 }
 0x6b6   : > { %2337 = vmatprep.subr.bf16.mxu0 %v3504_v56 }
 0x6b9   : > { %2338 = vmatpush1.bf16.msra.mxu0 %v3502_v57 }
 0x6ba   : > { %2339 = vmatprep.subr.bf16.mxu0 %v3507_v4 }
 0x6bd   : > { %2340 = vmatpush1.bf16.msra.mxu0 %v3505_v58 }
 0x6be   : > { %2341 = vmatprep.subr.bf16.mxu0 %v3510_v59 }
 0x6c1   : > { %2342 = vmatpush1.bf16.msra.mxu0 %v3508_v0 }
 0x6c2   : > { %2343 = vmatprep.subr.bf16.mxu0 %v3513_v60 }
 0x6c5   : > { %2344 = vmatpush1.bf16.msra.mxu0 %v3511_v61 }
 0x6c8   : > { %3062 = vmatmul.mubr.msk.bf16.vlgmr.msra.gmra.mrb[8].mxu0 %vm3060_vm10, %v3061_v63 }
 0x79b   : > { %v2363_v7 = vpop.f32.mrb[8].mxu0 }
 0x79c   : > { %v2384_v9 = vmul.f32 %v2377_v3, %v2363_v7  ;;  %v2365_v10 = vpop.f32.mrb[9].mxu0 }
 0x79d   : > { %v2385_v11 = vmul.f32 %v2381_v5, %v2365_v10  ;;  %v2367_v12 = vpop.f32.mrb[10].mxu0 }
 0x79e   : > { %v2398_v13 = vadd.f32 %v2391_v6, %v2384_v9  ;;  %v2368_v14 = vpop.f32.mrb[11].mxu0 }
 0x79f   : > { %v2399_v15 = vadd.f32 %v2395_v8, %v2385_v11 }
 0x7a0   : > { %v2400_v16 = vmax.f32 %v2398_v13, 0.0 }
 0x7a1   : > { %v2401_v17 = vmax.f32 %v2399_v15, 0.0 }
 0x7a2   : > { %v2403_v18 = vpack.c.bf16 %v2400_v16, %v2400_v16 }
 0x7a3   : > { %v2404_v19 = vpack.c.bf16 %v2401_v17, %v2401_v17 }
 0x7a4   : > { %v2411_v21 = vsel %vm2409_vm11, %v2403_v18, 0 }
 0x7a5   : > { %3063 = vmatprep.subr.msk.bf16.mxu1 %vm2409_vm11, %v2404_v19 }
 0x7a6   : > { %2417 = vmatpush1.bf16.msra.mxu1 %v2411_v21 }
 0x7a7   : > { %3134 = vmatprep.subr.bf16.mxu1 %v3514_v20 }
 0x7a9   : > { %3064 = vmatmul.mubr.msk.bf16.vlgmr.msra.gmra.mrb[16].mxu1 %vm2405_vm12, %v2402_v40 }
 0x7aa   : > { %3135 = vmatpush3.bf16.msra.mxu1 %v3515_v42 }
 0x7ab   : > { %3136 = vmatprep.subr.bf16.mxu1 %v3516_v22 }
 0x7ae   : > { %3137 = vmatpush3.bf16.msra.mxu1 %v3517_v23 }
 0x7af   : > { %3138 = vmatprep.subr.bf16.mxu1 %v3518_v24 }
 0x7b2   : > { %3139 = vmatpush3.bf16.msra.mxu1 %v3519_v25 }
 0x7b3   : > { %3140 = vmatprep.subr.bf16.mxu1 %v3520_v26 }
 0x7b6   : > { %3141 = vmatpush3.bf16.msra.mxu1 %v3521_v27 }
 0x7b7   : > { %3142 = vmatprep.subr.bf16.mxu1 %v3522_v28 }
 0x7ba   : > { %3143 = vmatpush3.bf16.msra.mxu1 %v3523_v29 }
 0x7bb   : > { %3144 = vmatprep.subr.bf16.mxu1 %v3524_v30 }
 0x7be   : > { %3145 = vmatpush3.bf16.msra.mxu1 %v3525_v31 }
 0x7bf   : > { %3146 = vmatprep.subr.bf16.mxu1 %v3526_v32 }
 0x7c2   : > { %3147 = vmatpush3.bf16.msra.mxu1 %v3527_v33 }
 0x7c3   : > { %3148 = vmatprep.subr.bf16.mxu1 %v3528_v34 }
 0x7c6   : > { %3149 = vmatpush3.bf16.msra.mxu1 %v3529_v35 }
 0x87c   : > { %v2450_v36 = vpop.f32.mrb[16].mxu1 }
 0x87d   : > { %v2452_v37 = vpop.f32.mrb[17].mxu1  ;;  %v2457_v41 = vpack.c.bf16 %v2450_v36, %v2450_v36 }
 0x87e   : > { %v2458_v38 = vpack.c.bf16 %v2452_v37, %v2452_v37  ;;  %v2454_v39 = vpop.f32.mrb[18].mxu1 }
 0x87f   : > { %v2455_v43 = vpop.f32.mrb[19].mxu1 }
 0x880   : > { %2619 = vmatprep.mubr.bf16.mxu1 %v2458_v38 }
 0x881   : > { %2620 = vmatmul.mubr.bf16.vlgmr.msra.gmra.mrb[20].mxu1 %v2457_v41 }
 0x882   : > { %3741 = shalt.err (!%p3738_p8)
}
 0x883   : > { %s3742_s25 = scalar_lea.hbm %s4392_s20, 64  ;;  %s3746_s8 = scalar_lea.hbm %s4569_s9, 128 }
 0x884   : > { %p3743_p4 = scmp.ne.s32.totalorder %s4392_s20, %s3742_s25  ;;  %p3747_p3 = scmp.lt.u32.totalorder %s4392_s20, %s4569_s9 }
 0x885   : > { %p3748_p5 = scmp.lt.u32.totalorder %s3746_s8, %s3742_s25  ;;  %p3750_p6 = scmp.lt.u32.totalorder %s3742_s25, %s4392_s20 }
 0x886   : > { %p3744_p10 = pnand %p3743_p4, %p4570_p9 }
 0x887   : > { %p3749_p7 = por %p3748_p5, %p3747_p3 }
 0x888   : > { %p3745_p11 = pneg %p3744_p10 }
 0x889   : > { %p3751_p12 = por %p3750_p6, %p3749_p7 }
 0x88b   : > { %p3752_p1 = pnand %p3751_p12, %p3745_p11 }
 0x88d   : > { %3755 = shalt.err (!%p3752_p1)
}
 0x88e   : > { %3207 = dma.vmem_to_hbm [thread:$0]  (%p4570_p9), %s2666_s0, 64, %s4392_s20, %s4395_s2  }
 0x88f   : > { %s3084_s4 = sshll.u32 %s3999_s1, 7  ;;  %s2652_s19 = sshll.u32 %s4317_s16, 4  ;;  %s2653_s19 = int_to_ptr.vmem [resolvable:$true] %s2652_s19 }
 0x890   : > { %s4571_s12 = sld [smem:[#allocation36_spill]]  ;;  %s2629_s25 = scalar_lea.sflag [#allocation4], %s4263_s14 }
 0x891   : > { %s3756_s24 = scalar_lea.vmem %s2653_s19, 128  ;;  %s3881_s3 = smov [#allocation14]  }
 0x892   : > { %p3757_p13 = scmp.ne.s32.totalorder %s2653_s19, %s3756_s24  ;;  %s3760_s5 = sshll.u32 %s3881_s3, 4  ;;  %s3761_s5 = int_to_ptr.vmem [resolvable:$false] %s3760_s5 }
 0x893   : > { %s3762_s6 = scalar_lea.vmem %s3761_s5, 256  ;;  %p3763_p8 = scmp.lt.s32.totalorder %s2653_s19, %s3761_s5 }
 0x894   : > { %p3758_p0 = pnand %p3757_p13, %p4570_p9  ;;  %p3764_p4 = scmp.lt.s32.totalorder %s3762_s6, %s3756_s24 }
 0x896   : > { %s4420_s8 = scalar_lea.hbm %s4571_s12, %s3084_s4  ;;  %p3759_p2 = pneg %p3758_p0 }
 0x897   : > { %p3765_p10 = por %p3764_p4, %p3763_p8 }
 0x899   : > { %p3766_p11 = pnand %p3765_p10, %p3759_p2 }
 0x89b   : > { %3769 = shalt.err (!%p3766_p11)
}
 0x89c   : > { %s3770_s16 = scalar_lea.hbm %s4420_s8, 128  ;;  %s3774_s4 = scalar_lea.hbm %s4571_s12, 256 }
 0x89d   : > { %p3771_p3 = scmp.ne.s32.totalorder %s4420_s8, %s3770_s16  ;;  %p3775_p6 = scmp.lt.u32.totalorder %s4420_s8, %s4571_s12 }
 0x89e   : > { %p3776_p12 = scmp.lt.u32.totalorder %s3774_s4, %s3770_s16  ;;  %p3778_p13 = scmp.lt.u32.totalorder %s3770_s16, %s4420_s8 }
 0x89f   : > { %p3772_p5 = pnand %p3771_p3, %p4570_p9 }
 0x8a0   : > { %p3777_p1 = por %p3776_p12, %p3775_p6 }
 0x8a1   : > { %p3773_p7 = pneg %p3772_p5 }
 0x8a2   : > { %p3779_p0 = por %p3778_p13, %p3777_p1 }
 0x8a4   : > { %p3780_p2 = pnand %p3779_p0, %p3773_p7 }
 0x8a6   : > { %3783 = shalt.err (!%p3780_p2)
}
 0x8a7   : > { %3206 = dma.vmem_to_hbm [thread:$0]  (%p4570_p9), %s2653_s19, 128, %s4420_s8, %s2629_s25  }
 0x8a8   : > { %s2888_s6 = sshll.u32 %s4263_s14, 1  ;;  %s3086_s3 = sshll.u32 %s3999_s1, 5 }
 0x8a9   : > { %s698_s18 = scalar_lea.vmem [#allocation17], %s2888_s6  ;;  %s4572_s0 = sld [smem:[#allocation38_spill]] }
 0x8aa   : > { %s2678_s24 = sshll.u32 %s698_s18, 4  ;;  %s3882_s1 = smov [#allocation17]   ;;  %s4447_s24 = int_to_ptr.vmem [resolvable:$true] %s2678_s24 }
 0x8ab   : > { %s3784_s14 = scalar_lea.vmem %s4447_s24, 32  ;;  %s3788_s19 = sshll.u32 %s3882_s1, 4  ;;  %s3789_s19 = int_to_ptr.vmem [resolvable:$false] %s3788_s19 }
 0x8ac   : > { %p3785_p8 = scmp.ne.s32.totalorder %s4447_s24, %s3784_s14  ;;  %s3790_s8 = scalar_lea.vmem %s3789_s19, 64 }
 0x8ad   : > { %p3791_p11 = scmp.lt.s32.totalorder %s4447_s24, %s3789_s19  ;;  %p3792_p3 = scmp.lt.s32.totalorder %s3790_s8, %s3784_s14 }
 0x8ae   : > { %p3786_p4 = pnand %p3785_p8, %p4570_p9 }
 0x8af   : > { %s4445_s4 = scalar_lea.hbm %s4572_s0, %s3086_s3  ;;  %p3793_p5 = por %p3792_p3, %p3791_p11 }
 0x8b0   : > { %p3787_p10 = pneg %p3786_p4 }
 0x8b2   : > { %p3794_p7 = pnand %p3793_p5, %p3787_p10 }
 0x954   : > { %v3150_v44 = vpop.f32.mrb[20].mxu1 }
 0x955   : > { %v3151_v45 = vpop.f32.mrb[21].mxu1 }
 0x956   : > { %v3152_v46 = vadd.f32 %v3151_v45, %v3150_v44  ;;  %v3153_v47 = vpop.f32.mrb[22].mxu1 }
 0x957   : > { %v3154_v48 = vpop.f32.mrb[23].mxu1 }
 0x958   : > { %2627 = vst [vmem:[%s698_s18] sm:$0x3] %v3152_v46 }
 0x959   : > { %3797 = shalt.err (!%p3794_p7)
}
 0x95a   : > { %s3798_s25 = scalar_lea.hbm %s4445_s4, 32  ;;  %s3802_s6 = scalar_lea.hbm %s4572_s0, 64 }
 0x95b   : > { %p3799_p6 = scmp.ne.s32.totalorder %s4445_s4, %s3798_s25  ;;  %p3803_p13 = scmp.lt.u32.totalorder %s4445_s4, %s4572_s0 }
 0x95c   : > { %p3804_p0 = scmp.lt.u32.totalorder %s3802_s6, %s3798_s25  ;;  %p3806_p8 = scmp.lt.u32.totalorder %s3798_s25, %s4445_s4 }
 0x95d   : > { %p3800_p12 = pnand %p3799_p6, %p4570_p9 }
 0x95e   : > { %p3805_p2 = por %p3804_p0, %p3803_p13 }
 0x95f   : > { %p3801_p1 = pneg %p3800_p12 }
 0x960   : > { %p3807_p4 = por %p3806_p8, %p3805_p2 }
 0x962   : > { %p3808_p10 = pnand %p3807_p4, %p3801_p1 }
 0x964   : > { %3811 = shalt.err (!%p3808_p10)
}
 0x965   : > { %3208 = dma.vmem_to_hbm [thread:$0]  (%p4570_p9), %s4447_s24, 32, %s4445_s4, %s4395_s2  }
 0x966 PF: > { %s2690_s20 = sand.u32 1, %s3854_s27   ;;  %p4573_p11 = scmp.ne.s32.totalorder %s4547_s22, 0 }
 0x967   : > { %p4574_p3 = scmp.ge.s32.totalorder %s3866_s30, 2  ;;  %s2691_s16 = scalar_lea.sflag [#allocation4], %s2690_s20 }
 0x969   : > { %p3236_p5 = pnand %p4574_p3, %p4573_p11 }
 0x96b   : > { %3845 = dma.done.wait (!%p3236_p5), %s2691_s16, 128  }
 0x96c   : > { %3847 = vsyncadd (!%p3236_p5), %s2691_s16, 4294967168  ;;  %s4575_s14 = sadd.s32 4294967294, %s3866_s30  }
 0x96d   : > { %s2699_s1 = sand.u32 1, %s4575_s14  }
 0x96e   : > { %s2700_s19 = scalar_lea.sflag [#allocation16], %s2699_s1 }
 0x96f   : > { %3849 = dma.done.wait (!%p3236_p5), %s2700_s19, 96  }
 0x970   : > { %3851 = vsyncadd (!%p3236_p5), %s2700_s19, 4294967200  ;;  %p38_p9 = scmp.ge.s32.totalorder %s4179_s21, 4   ;;  %s4576_s27 = smov %s3858_s28 }
 0x971   : > { %s4577_s28 = smov %s3862_s29  ;;  %s4578_s29 = smov %s4190_s26 }
 0x972   : > { %s4579_s30 = smov %s4179_s21  ;;  %40 = sbr.rel (!%p38_p9) target bundleno = 26 (0x1a), region = 191 }
 0x979   :  { %2714 = vsyncpa [#allocation3], 1 }
 0x97a   :  { %2716 = vsyncpa [#allocation3 + $0x1], 1 }
 0x97b   :  { %2717 = vsyncpa [#allocation6], 1 }
 0x97c   :  { %2718 = vsyncpa [#allocation9], 1 }
 0x97d   :  { %2719 = vsyncpa [#allocation12], 1 }
 0x97e   :  { %2720 = vsyncpa [#allocation4], 1 }
 0x97f   :  { %2722 = vsyncpa [#allocation4 + $0x1], 1 }
 0x980   :  { %2723 = vsyncpa [#allocation16], 1 }
 0x981   :  { %2725 = vsyncpa [#allocation16 + $0x1], 1 }

</bundles_post_ra>
